<compile_context>
chip_gen: v7x
topology: tpu7x:2x2x1
jax: 0.10.0
libtpu: 0.0.40
codegen_flags: <defaults>
</compile_context>

<pallas_src>
import numpy as np
import jax
import jax.numpy as jnp
from jax import lax
from jax.experimental import pallas as pl
from jax.experimental.pallas import tpu as pltpu


def _round_up(x, m):
    return ((x + m - 1) // m) * m


# ----------------------------------------------------------------------------
# Pallas kernel (gridless; all operands VMEM-resident — shapes are small/padded).
#
# Refs:
#   gx_ref     (S, Bp, 4*Hp)   pre-projected gate activations (x @ W_ih + b), time-major,
#                              gate blocks ordered [i | f | o | g], each Hp lanes wide
#   w_hh_ref   (Hp, 4*Hp)      hidden->gates weights (padded, same gate order)
#   w_out_ref  (Hp, Vp)        Linear weight, transposed + padded (f32 or bf16)
#   b_out_ref  (1, Vp)         Linear bias (f32, padded)
#   h0_ref     (Bp, Hp)
#   c0_ref     (Bp, Hp)
# Outputs:
#   logits_ref (S, Bp, Vp)
#   hn_ref     (Bp, Hp)
#   cn_ref     (Bp, Hp)
# Scratch:
#   h_all_ref  (S, Bp, Hp)     per-step hidden states (projected after the loop)
# ----------------------------------------------------------------------------
def lstm_lm_kernel(gx_ref, w_hh_ref, w_out_ref, b_out_ref, h0_ref, c0_ref,
                   logits_ref, hn_ref, cn_ref, h_all_ref):
    S, Bp, _ = gx_ref.shape
    Hp = h0_ref.shape[-1]
    Vp = w_out_ref.shape[-1]

    w_hh = w_hh_ref[...]                                   # hoisted out of the loop

    # Serial recurrence: exactly one small (Bp,Hp)x(Hp,4Hp) f32 matmul per step, plus one
    # fused sigmoid over the contiguous [i|f|o] block and one tanh over [g].
    def step(t, carry):
        h, c = carry
        gates = gx_ref[t] + jnp.dot(h, w_hh, preferred_element_type=jnp.float32)
        sig = jax.nn.sigmoid(gates[:, :3 * Hp])            # i, f, o in one EUP pass
        g_g = jnp.tanh(gates[:, 3 * Hp:])
        i_g = sig[:, 0 * Hp:1 * Hp]
        f_g = sig[:, 1 * Hp:2 * Hp]
        o_g = sig[:, 2 * Hp:3 * Hp]
        c_new = f_g * c + i_g * g_g
        h_new = o_g * jnp.tanh(c_new)
        h_all_ref[t] = h_new
        return h_new, c_new

    unroll = True if S <= 16 else 8                        # cap unroll for long sequences
    h_fin, c_fin = lax.fori_loop(0, S, step, (h0_ref[...], c0_ref[...]), unroll=unroll)
    hn_ref[...] = h_fin
    cn_ref[...] = c_fin
    # TODO(synk): hold W_hh in MXU weight registers across the time loop via
    # pltpu.matmul_push_rhs / matmul_acc_lhs / matmul_pop once per-chip staging capacity
    # is verified; at Bp=8 each per-step dot is dominated by re-pushing the RHS.

    # Batched vocab projection: one MXU matmul (bf16-native when w_out is bf16, f32
    # accumulation) + one lane-dense store.
    w_out = w_out_ref[...]
    h_flat = h_all_ref[...].reshape(S * Bp, Hp).astype(w_out.dtype)
    logits = (jnp.dot(h_flat, w_out, preferred_element_type=jnp.float32)
              + b_out_ref[...])                            # (S*Bp, Vp)
    logits_ref[...] = logits.reshape(S, Bp, Vp)


def lstm_lm_pallas(gx, w_hh_p, w_out_p, b_out_p, h0_p, c0_p):
    S, Bp, _ = gx.shape
    Hp = h0_p.shape[-1]
    Vp = w_out_p.shape[-1]

    vmem = pl.BlockSpec(memory_space=pltpu.MemorySpace.VMEM)

    return pl.pallas_call(
        lstm_lm_kernel,
        in_specs=[vmem] * 6,
        out_specs=(vmem, vmem, vmem),
        out_shape=(
            jax.ShapeDtypeStruct((S, Bp, Vp), jnp.float32),
            jax.ShapeDtypeStruct((Bp, Hp), jnp.float32),
            jax.ShapeDtypeStruct((Bp, Hp), jnp.float32),
        ),
        scratch_shapes=[
            pltpu.VMEM((S, Bp, Hp), jnp.float32),          # per-step hidden states
        ],
    )(gx, w_hh_p, w_out_p, b_out_p, h0_p, c0_p)
    # TODO(synk): for realistic vocab sizes, tile the vocab projection over a grid axis
    # (TILE_V ~1024) or split it into its own pallas_call with a 'parallel' V axis
    # (v7x has 2 TensorCores), and set pltpu.CompilerParams(vmem_limit_bytes=...);
    # the all-resident W_out/logits layout overruns v7x's 64 MiB VMEM / v5e's 16 MiB
    # default scoped limit at large V.  Unnecessary at these toy shapes.


# ----------------------------------------------------------------------------
# Model wrapper: embedding glue + the W_ih fold in plain JAX (done once), recurrence +
# vocab projection in Pallas.  All padding/transposition precomputed in __init__.
# ----------------------------------------------------------------------------
class LSTMLanguageModelerPallas:
    LANE = 128                    # lane width (last-dim alignment)
    SUBLANE = 8                   # f32 sublane count (batch alignment)
    GATE_PACK_ORDER = (0, 1, 3, 2)  # source gates (i,f,g,o) packed as (i,f,o,g)

    def __init__(self, num_channels, hidden_dim, vocab_size, pre_trained_weights_np, key,
                 projection_dtype=jnp.float32):
        assert num_channels == 2, "static + dynamic embedding channels"
        self.pre_trained_vocab_len = pre_trained_weights_np.shape[0]
        self.new_words_len = vocab_size - self.pre_trained_vocab_len
        self.embedding_dim = pre_trained_weights_np.shape[1]
        self.hidden_dim = hidden_dim
        self.vocab_size = vocab_size
        D = num_channels * self.embedding_dim
        H = hidden_dim
        V = vocab_size

        ks = jax.random.split(key, 8)

        # ---- embeddings (deterministic synthetic init; matches the module's init) ----
        self.static_embedding = jnp.asarray(pre_trained_weights_np, jnp.float32)
        gain = float(np.sqrt(2.0))   # calculate_gain('relu')
        bound = gain * np.sqrt(6.0 / (self.new_words_len + self.embedding_dim))
        self.static_dummy_embedding = jax.random.uniform(
            ks[0], (self.new_words_len, self.embedding_dim), jnp.float32, -bound, bound)
        # Concatenated static table; dynamic table is initialized to the same values
        # (exactly what the PyTorch module's init_embeddings does).
        self.static_full_table = jnp.concatenate(
            [self.static_embedding, self.static_dummy_embedding], axis=0)    # (V, E)
        self.dynamic_embedding = self.static_full_table

        # ---- LSTM params (PyTorch layout: (4H, D)/(4H, H), gate order i,f,g,o) ----
        k = 1.0 / np.sqrt(H)
        self.weight_ih = jax.random.uniform(ks[1], (4 * H, D), jnp.float32, -k, k)
        self.weight_hh = jax.random.uniform(ks[2], (4 * H, H), jnp.float32, -k, k)
        self.bias_ih = jax.random.uniform(ks[3], (4 * H,), jnp.float32, -k, k)
        self.bias_hh = jax.random.uniform(ks[4], (4 * H,), jnp.float32, -k, k)

        # ---- Linear hidden -> vocab ----
        kl = 1.0 / np.sqrt(H)
        self.lin_w = jax.random.uniform(ks[5], (V, H), jnp.float32, -kl, kl)
        self.lin_b = jax.random.uniform(ks[6], (V,), jnp.float32, -kl, kl)

        # ---- Pack padded / transposed kernel weights (lane-aligned, gate order i,f,o,g) ----
        Hp = _round_up(H, self.LANE)
        Vp = _round_up(V, self.LANE)
        self.Hp, self.Vp = Hp, Vp

        w_ih_np = np.asarray(self.weight_ih)     # (4H, D)
        w_hh_np = np.asarray(self.weight_hh)     # (4H, H)
        b_comb = np.asarray(self.bias_ih + self.bias_hh)

        w_ih_pack = np.zeros((D, 4 * Hp), np.float32)
        w_hh_pack = np.zeros((Hp, 4 * Hp), np.float32)
        b_pack = np.zeros((1, 4 * Hp), np.float32)
        for dst, src in enumerate(self.GATE_PACK_ORDER):
            w_ih_pack[:, dst * Hp:dst * Hp + H] = w_ih_np[src * H:(src + 1) * H, :].T
            w_hh_pack[:H, dst * Hp:dst * Hp + H] = w_hh_np[src * H:(src + 1) * H, :].T
            b_pack[0, dst * Hp:dst * Hp + H] = b_comb[src * H:(src + 1) * H]
        # Zero-pad invariant (relied on for correctness): padded gate columns / padded
        # hidden rows must stay all-zero so padded hidden/cell lanes remain exactly 0.
        real_cols = np.zeros(4 * Hp, dtype=bool)
        for dst in range(4):
            real_cols[dst * Hp:dst * Hp + H] = True
        assert not b_pack[0, ~real_cols].any(), "padded gate bias must be zero"
        assert not w_hh_pack[:, ~real_cols].any() and not w_hh_pack[H:, :].any(), \
            "padded W_hh rows/columns must be zero"

        # ---- Fold the input projection into the embedding tables (review item #1) ----
        # gx_table[v] = concat(static(v), dynamic(v)) @ W_ih_pack + b_pack   -> (V, 4*Hp)
        # NOTE: recompute this table whenever W_ih or the embedding tables change.
        concat_table = jnp.concatenate(
            [self.static_full_table, self.dynamic_embedding], axis=1)        # (V, D)
        self.gx_table = (jnp.dot(concat_table, jnp.asarray(w_ih_pack),
                                 precision=jax.lax.Precision.HIGHEST)
                         + jnp.asarray(b_pack))                              # (V, 4*Hp)

        self.w_hh_pad = jnp.asarray(w_hh_pack)

        w_out_pack = np.zeros((Hp, Vp), np.float32)
        w_out_pack[:H, :V] = np.asarray(self.lin_w).T
        b_out_pack = np.zeros((1, Vp), np.float32)
        b_out_pack[0, :V] = np.asarray(self.lin_b)
        # bf16 vocab-projection weights use the bf16-native MXU on v6e/v7x and halve the
        # W_out footprint; accumulation stays f32 inside the kernel.
        self.w_out_pad = jnp.asarray(w_out_pack).astype(projection_dtype)
        self.b_out_pad = jnp.asarray(b_out_pack)

    def init_hidden(self, batch_size):
        return (jnp.zeros((1, batch_size, self.hidden_dim), jnp.float32),
                jnp.zeros((1, batch_size, self.hidden_dim), jnp.float32))

    def get_batch_word_embeddings(self, batch_sequences):
        """Batch-first gather, used by the pure-JAX reference."""
        stat = jnp.take(self.static_full_table, batch_sequences, axis=0)     # (B, S, E)
        dyn = jnp.take(self.dynamic_embedding, batch_sequences, axis=0)      # (B, S, E)
        return jnp.concatenate([stat, dyn], axis=-1)                         # (B, S, 2E)

    def forward(self, batch_sequences, hidden):
        h0, c0 = hidden                                                      # (1, B, H)
        B, S = batch_sequences.shape
        H, Hp, V = self.hidden_dim, self.Hp, self.vocab_size
        Bp = _round_up(max(B, self.SUBLANE), self.SUBLANE)

        # Time-major gather directly into pre-projected gate space: (S, B, 4*Hp),
        # lane-dense (4*Hp is a multiple of 128).  No x@W_ih matmul anywhere.
        ids_t = batch_sequences.T                                            # (S, B)
        gx = jnp.take(self.gx_table, ids_t, axis=0)                          # (S, B, 4Hp)
        gx = jnp.pad(gx, ((0, 0), (0, Bp - B), (0, 0)))                      # (S, Bp, 4Hp)

        h0_p = jnp.pad(h0[0], ((0, Bp - B), (0, Hp - H)))
        c0_p = jnp.pad(c0[0], ((0, Bp - B), (0, Hp - H)))

        logits_p, hn_p, cn_p = lstm_lm_pallas(
            gx, self.w_hh_pad, self.w_out_pad, self.b_out_pad, h0_p, c0_p)

        # TODO(synk): for realistic V this batch-first transpose re-reads/re-writes the
        # full logits tensor in HBM; expose a time-major (S, B, V) output to the loss
        # (or emit bf16 logits) to remove it.
        vocab_space = jnp.transpose(logits_p[:, :B, :V], (1, 0, 2))          # (B, S, V)
        h_n = hn_p[:B, :H][None]                                             # (1, B, H)
        c_n = cn_p[:B, :H][None]
        return vocab_space, (h_n, c_n)


# ----------------------------------------------------------------------------
# Pure-JAX reference (mirrors torch.nn.LSTM + Linear) for verification.
# ----------------------------------------------------------------------------
def ref_forward(model, batch_sequences, hidden):
    h0, c0 = hidden
    embeds = model.get_batch_word_embeddings(batch_sequences)               # (B, S, D)
    x_tbd = jnp.transpose(embeds, (1, 0, 2))                                 # (S, B, D)

    def step(carry, x_t):
        h, c = carry
        gates = (x_t @ model.weight_ih.T + model.bias_ih
                 + h @ model.weight_hh.T + model.bias_hh)
        i, f, g, o = jnp.split(gates, 4, axis=-1)
        i, f, o = jax.nn.sigmoid(i), jax.nn.sigmoid(f), jax.nn.sigmoid(o)
        g = jnp.tanh(g)
        c = f * c + i * g
        h = o * jnp.tanh(c)
        return (h, c), h

    (hN, cN), hs = lax.scan(step, (h0[0], c0[0]), x_tbd)
    lstm_out = jnp.transpose(hs, (1, 0, 2))                                  # (B, S, H)
    logits = lstm_out @ model.lin_w.T + model.lin_b
    return logits, (hN[None], cN[None])


if __name__ == "__main__":
    # Small shapes consistent with the module's forward:
    batch, seq_len = 2, 8
    embedding_dim, num_channels, hidden_dim = 16, 2, 32
    pre_trained_len, new_words = 10, 6
    vocab_size = pre_trained_len + new_words

    key = jax.random.PRNGKey(0)
    k_pre, k_ids, k_model = jax.random.split(key, 3)

    pre_trained_weights_np = np.asarray(
        jax.random.normal(k_pre, (pre_trained_len, embedding_dim), jnp.float32) * 0.1)

    batch_sequences = jax.random.randint(
        k_ids, (batch, seq_len), 0, vocab_size, dtype=jnp.int32)

    # --- f32 projection weights: tight verification against the pure-JAX reference. ---
    model_f32 = LSTMLanguageModelerPallas(
        num_channels, hidden_dim, vocab_size, pre_trained_weights_np, k_model,
        projection_dtype=jnp.float32)
    hidden = model_f32.init_hidden(batch)

    vocab_space, (h_n, c_n) = model_f32.forward(batch_sequences, hidden)
    jax.block_until_ready((vocab_space, h_n, c_n))

    ref_logits, (ref_h, ref_c) = ref_forward(model_f32, batch_sequences, hidden)
    np.testing.assert_allclose(np.asarray(vocab_space), np.asarray(ref_logits),
                               rtol=1e-5, atol=1e-4)
    np.testing.assert_allclose(np.asarray(h_n), np.asarray(ref_h), rtol=1e-5, atol=1e-4)
    np.testing.assert_allclose(np.asarray(c_n), np.asarray(ref_c), rtol=1e-5, atol=1e-4)
    assert vocab_space.shape == (batch, seq_len, vocab_size)
    assert h_n.shape == (1, batch, hidden_dim) and c_n.shape == (1, batch, hidden_dim)

    # --- bf16 vocab-projection weights (v6e/v7x MXU-native path); looser tolerance. ---
    model_bf16 = LSTMLanguageModelerPallas(
        num_channels, hidden_dim, vocab_size, pre_trained_weights_np, k_model,
        projection_dtype=jnp.bfloat16)
    vocab_bf16, (h_b, c_b) = model_bf16.forward(batch_sequences, hidden)
    jax.block_until_ready((vocab_bf16, h_b, c_b))
    np.testing.assert_allclose(np.asarray(vocab_bf16), np.asarray(ref_logits),
                               rtol=2e-2, atol=2e-2)
    # Recurrence is still f32 — hidden/cell states are unchanged by the bf16 projection.
    np.testing.assert_allclose(np.asarray(h_b), np.asarray(ref_h), rtol=1e-5, atol=1e-4)
    np.testing.assert_allclose(np.asarray(c_b), np.asarray(ref_c), rtol=1e-5, atol=1e-4)

    print("KERNEL_OK")
</pallas_src>

<mosaic_0001>
module attributes {stable_mosaic.version = 11 : i64} {
  func.func @lstm_lm_kernel(%arg0: memref<8x8x512xf32, #tpu.memory_space<vmem>>, %arg1: memref<128x512xf32, #tpu.memory_space<vmem>>, %arg2: memref<128x128xf32, #tpu.memory_space<vmem>>, %arg3: memref<1x128xf32, #tpu.memory_space<vmem>>, %arg4: memref<8x128xf32, #tpu.memory_space<vmem>>, %arg5: memref<8x128xf32, #tpu.memory_space<vmem>>, %arg6: memref<8x8x128xf32, #tpu.memory_space<vmem>>, %arg7: memref<8x128xf32, #tpu.memory_space<vmem>>, %arg8: memref<8x128xf32, #tpu.memory_space<vmem>>, %arg9: memref<8x8x128xf32, #tpu.memory_space<vmem>>) attributes {dimension_semantics = [], scalar_prefetch = 0 : i64, scratch_operands = 1 : i64, tpu.core_type = #tpu.core_type<tc>} {
    %c0 = arith.constant 0 : index
    %c0_0 = arith.constant 0 : index
    %0 = vector.load %arg1[%c0, %c0_0] : memref<128x512xf32, #tpu.memory_space<vmem>>, vector<128x512xf32>
    %c0_1 = arith.constant 0 : index
    %c0_2 = arith.constant 0 : index
    %1 = vector.load %arg4[%c0_1, %c0_2] : memref<8x128xf32, #tpu.memory_space<vmem>>, vector<8x128xf32>
    %c0_3 = arith.constant 0 : index
    %c0_4 = arith.constant 0 : index
    %2 = vector.load %arg5[%c0_3, %c0_4] : memref<8x128xf32, #tpu.memory_space<vmem>>, vector<8x128xf32>
    %c0_i32 = arith.constant 0 : i32
    %3 = arith.index_cast %c0_i32 : i32 to index
    %c0_5 = arith.constant 0 : index
    %c0_6 = arith.constant 0 : index
    %4 = vector.load %arg0[%3, %c0_5, %c0_6] : memref<8x8x512xf32, #tpu.memory_space<vmem>>, vector<1x8x512xf32>
    %5 = vector.shape_cast %4 : vector<1x8x512xf32> to vector<8x512xf32>
    %cst = arith.constant dense<0.000000e+00> : vector<8x512xf32>
    %6 = tpu.matmul %1, %0, %cst {dimension_numbers = #tpu.dot_dimension_numbers<[1], [0], [0], [1], [0, 0, 1, 1], [], []>} : vector<8x128xf32>, vector<128x512xf32>, vector<8x512xf32> -> vector<8x512xf32>
    %7 = arith.addf %5, %6 : vector<8x512xf32>
    %8 = vector.extract_strided_slice %7 {offsets = [0, 0], sizes = [8, 384], strides = [1, 1]} : vector<8x512xf32> to vector<8x384xf32>
    %9 = arith.negf %8 : vector<8x384xf32>
    %10 = math.exp %9 : vector<8x384xf32>
    %cst_7 = arith.constant 1.000000e+00 : f32
    %11 = vector.broadcast %cst_7 : f32 to vector<8x384xf32>
    %12 = arith.addf %11, %10 : vector<8x384xf32>
    %13 = arith.divf %11, %12 : vector<8x384xf32>
    %14 = vector.extract_strided_slice %7 {offsets = [0, 384], sizes = [8, 128], strides = [1, 1]} : vector<8x512xf32> to vector<8x128xf32>
    %15 = math.tanh %14 : vector<8x128xf32>
    %16 = vector.extract_strided_slice %13 {offsets = [0, 0], sizes = [8, 128], strides = [1, 1]} : vector<8x384xf32> to vector<8x128xf32>
    %17 = vector.extract_strided_slice %13 {offsets = [0, 128], sizes = [8, 128], strides = [1, 1]} : vector<8x384xf32> to vector<8x128xf32>
    %18 = vector.extract_strided_slice %13 {offsets = [0, 256], sizes = [8, 128], strides = [1, 1]} : vector<8x384xf32> to vector<8x128xf32>
    %19 = arith.mulf %17, %2 : vector<8x128xf32>
    %20 = arith.mulf %16, %15 : vector<8x128xf32>
    %21 = arith.addf %19, %20 : vector<8x128xf32>
    %22 = math.tanh %21 : vector<8x128xf32>
    %23 = arith.mulf %18, %22 : vector<8x128xf32>
    %24 = arith.index_cast %c0_i32 : i32 to index
    %c0_8 = arith.constant 0 : index
    %c0_9 = arith.constant 0 : index
    %25 = vector.load %arg9[%24, %c0_8, %c0_9] : memref<8x8x128xf32, #tpu.memory_space<vmem>>, vector<1x8x128xf32>
    %26 = vector.shape_cast %25 : vector<1x8x128xf32> to vector<8x128xf32>
    %27 = vector.shape_cast %23 : vector<8x128xf32> to vector<1x8x128xf32>
    tpu.vector_store %arg9[%24, %c0_8, %c0_9], %27 {strides = array<i32>} : memref<8x8x128xf32, #tpu.memory_space<vmem>>, vector<1x8x128xf32>,
    %c1_i32 = arith.constant 1 : i32
    %28 = arith.index_cast %c1_i32 : i32 to index
    %c0_10 = arith.constant 0 : index
    %c0_11 = arith.constant 0 : index
    %29 = vector.load %arg0[%28, %c0_10, %c0_11] : memref<8x8x512xf32, #tpu.memory_space<vmem>>, vector<1x8x512xf32>
    %30 = vector.shape_cast %29 : vector<1x8x512xf32> to vector<8x512xf32>
    %cst_12 = arith.constant dense<0.000000e+00> : vector<8x512xf32>
    %31 = tpu.matmul %23, %0, %cst_12 {dimension_numbers = #tpu.dot_dimension_numbers<[1], [0], [0], [1], [0, 0, 1, 1], [], []>} : vector<8x128xf32>, vector<128x512xf32>, vector<8x512xf32> -> vector<8x512xf32>
    %32 = arith.addf %30, %31 : vector<8x512xf32>
    %33 = vector.extract_strided_slice %32 {offsets = [0, 0], sizes = [8, 384], strides = [1, 1]} : vector<8x512xf32> to vector<8x384xf32>
    %34 = arith.negf %33 : vector<8x384xf32>
    %35 = math.exp %34 : vector<8x384xf32>
    %cst_13 = arith.constant 1.000000e+00 : f32
    %36 = vector.broadcast %cst_13 : f32 to vector<8x384xf32>
    %37 = arith.addf %36, %35 : vector<8x384xf32>
    %38 = arith.divf %36, %37 : vector<8x384xf32>
    %39 = vector.extract_strided_slice %32 {offsets = [0, 384], sizes = [8, 128], strides = [1, 1]} : vector<8x512xf32> to vector<8x128xf32>
    %40 = math.tanh %39 : vector<8x128xf32>
    %41 = vector.extract_strided_slice %38 {offsets = [0, 0], sizes = [8, 128], strides = [1, 1]} : vector<8x384xf32> to vector<8x128xf32>
    %42 = vector.extract_strided_slice %38 {offsets = [0, 128], sizes = [8, 128], strides = [1, 1]} : vector<8x384xf32> to vector<8x128xf32>
    %43 = vector.extract_strided_slice %38 {offsets = [0, 256], sizes = [8, 128], strides = [1, 1]} : vector<8x384xf32> to vector<8x128xf32>
    %44 = arith.mulf %42, %21 : vector<8x128xf32>
    %45 = arith.mulf %41, %40 : vector<8x128xf32>
    %46 = arith.addf %44, %45 : vector<8x128xf32>
    %47 = math.tanh %46 : vector<8x128xf32>
    %48 = arith.mulf %43, %47 : vector<8x128xf32>
    %49 = arith.index_cast %c1_i32 : i32 to index
    %c0_14 = arith.constant 0 : index
    %c0_15 = arith.constant 0 : index
    %50 = vector.load %arg9[%49, %c0_14, %c0_15] : memref<8x8x128xf32, #tpu.memory_space<vmem>>, vector<1x8x128xf32>
    %51 = vector.shape_cast %50 : vector<1x8x128xf32> to vector<8x128xf32>
    %52 = vector.shape_cast %48 : vector<8x128xf32> to vector<1x8x128xf32>
    tpu.vector_store %arg9[%49, %c0_14, %c0_15], %52 {strides = array<i32>} : memref<8x8x128xf32, #tpu.memory_space<vmem>>, vector<1x8x128xf32>,
    %c2_i32 = arith.constant 2 : i32
    %53 = arith.index_cast %c2_i32 : i32 to index
    %c0_16 = arith.constant 0 : index
    %c0_17 = arith.constant 0 : index
    %54 = vector.load %arg0[%53, %c0_16, %c0_17] : memref<8x8x512xf32, #tpu.memory_space<vmem>>, vector<1x8x512xf32>
    %55 = vector.shape_cast %54 : vector<1x8x512xf32> to vector<8x512xf32>
    %cst_18 = arith.constant dense<0.000000e+00> : vector<8x512xf32>
    %56 = tpu.matmul %48, %0, %cst_18 {dimension_numbers = #tpu.dot_dimension_numbers<[1], [0], [0], [1], [0, 0, 1, 1], [], []>} : vector<8x128xf32>, vector<128x512xf32>, vector<8x512xf32> -> vector<8x512xf32>
    %57 = arith.addf %55, %56 : vector<8x512xf32>
    %58 = vector.extract_strided_slice %57 {offsets = [0, 0], sizes = [8, 384], strides = [1, 1]} : vector<8x512xf32> to vector<8x384xf32>
    %59 = arith.negf %58 : vector<8x384xf32>
    %60 = math.exp %59 : vector<8x384xf32>
    %cst_19 = arith.constant 1.000000e+00 : f32
    %61 = vector.broadcast %cst_19 : f32 to vector<8x384xf32>
    %62 = arith.addf %61, %60 : vector<8x384xf32>
    %63 = arith.divf %61, %62 : vector<8x384xf32>
    %64 = vector.extract_strided_slice %57 {offsets = [0, 384], sizes = [8, 128], strides = [1, 1]} : vector<8x512xf32> to vector<8x128xf32>
    %65 = math.tanh %64 : vector<8x128xf32>
    %66 = vector.extract_strided_slice %63 {offsets = [0, 0], sizes = [8, 128], strides = [1, 1]} : vector<8x384xf32> to vector<8x128xf32>
    %67 = vector.extract_strided_slice %63 {offsets = [0, 128], sizes = [8, 128], strides = [1, 1]} : vector<8x384xf32> to vector<8x128xf32>
    %68 = vector.extract_strided_slice %63 {offsets = [0, 256], sizes = [8, 128], strides = [1, 1]} : vector<8x384xf32> to vector<8x128xf32>
    %69 = arith.mulf %67, %46 : vector<8x128xf32>
    %70 = arith.mulf %66, %65 : vector<8x128xf32>
    %71 = arith.addf %69, %70 : vector<8x128xf32>
    %72 = math.tanh %71 : vector<8x128xf32>
    %73 = arith.mulf %68, %72 : vector<8x128xf32>
    %74 = arith.index_cast %c2_i32 : i32 to index
    %c0_20 = arith.constant 0 : index
    %c0_21 = arith.constant 0 : index
    %75 = vector.load %arg9[%74, %c0_20, %c0_21] : memref<8x8x128xf32, #tpu.memory_space<vmem>>, vector<1x8x128xf32>
    %76 = vector.shape_cast %75 : vector<1x8x128xf32> to vector<8x128xf32>
    %77 = vector.shape_cast %73 : vector<8x128xf32> to vector<1x8x128xf32>
    tpu.vector_store %arg9[%74, %c0_20, %c0_21], %77 {strides = array<i32>} : memref<8x8x128xf32, #tpu.memory_space<vmem>>, vector<1x8x128xf32>,
    %c3_i32 = arith.constant 3 : i32
    %78 = arith.index_cast %c3_i32 : i32 to index
    %c0_22 = arith.constant 0 : index
    %c0_23 = arith.constant 0 : index
    %79 = vector.load %arg0[%78, %c0_22, %c0_23] : memref<8x8x512xf32, #tpu.memory_space<vmem>>, vector<1x8x512xf32>
    %80 = vector.shape_cast %79 : vector<1x8x512xf32> to vector<8x512xf32>
    %cst_24 = arith.constant dense<0.000000e+00> : vector<8x512xf32>
    %81 = tpu.matmul %73, %0, %cst_24 {dimension_numbers = #tpu.dot_dimension_numbers<[1], [0], [0], [1], [0, 0, 1, 1], [], []>} : vector<8x128xf32>, vector<128x512xf32>, vector<8x512xf32> -> vector<8x512xf32>
    %82 = arith.addf %80, %81 : vector<8x512xf32>
    %83 = vector.extract_strided_slice %82 {offsets = [0, 0], sizes = [8, 384], strides = [1, 1]} : vector<8x512xf32> to vector<8x384xf32>
    %84 = arith.negf %83 : vector<8x384xf32>
    %85 = math.exp %84 : vector<8x384xf32>
    %cst_25 = arith.constant 1.000000e+00 : f32
    %86 = vector.broadcast %cst_25 : f32 to vector<8x384xf32>
    %87 = arith.addf %86, %85 : vector<8x384xf32>
    %88 = arith.divf %86, %87 : vector<8x384xf32>
    %89 = vector.extract_strided_slice %82 {offsets = [0, 384], sizes = [8, 128], strides = [1, 1]} : vector<8x512xf32> to vector<8x128xf32>
    %90 = math.tanh %89 : vector<8x128xf32>
    %91 = vector.extract_strided_slice %88 {offsets = [0, 0], sizes = [8, 128], strides = [1, 1]} : vector<8x384xf32> to vector<8x128xf32>
    %92 = vector.extract_strided_slice %88 {offsets = [0, 128], sizes = [8, 128], strides = [1, 1]} : vector<8x384xf32> to vector<8x128xf32>
    %93 = vector.extract_strided_slice %88 {offsets = [0, 256], sizes = [8, 128], strides = [1, 1]} : vector<8x384xf32> to vector<8x128xf32>
    %94 = arith.mulf %92, %71 : vector<8x128xf32>
    %95 = arith.mulf %91, %90 : vector<8x128xf32>
    %96 = arith.addf %94, %95 : vector<8x128xf32>
    %97 = math.tanh %96 : vector<8x128xf32>
    %98 = arith.mulf %93, %97 : vector<8x128xf32>
    %99 = arith.index_cast %c3_i32 : i32 to index
    %c0_26 = arith.constant 0 : index
    %c0_27 = arith.constant 0 : index
    %100 = vector.load %arg9[%99, %c0_26, %c0_27] : memref<8x8x128xf32, #tpu.memory_space<vmem>>, vector<1x8x128xf32>
    %101 = vector.shape_cast %100 : vector<1x8x128xf32> to vector<8x128xf32>
    %102 = vector.shape_cast %98 : vector<8x128xf32> to vector<1x8x128xf32>
    tpu.vector_store %arg9[%99, %c0_26, %c0_27], %102 {strides = array<i32>} : memref<8x8x128xf32, #tpu.memory_space<vmem>>, vector<1x8x128xf32>,
    %c4_i32 = arith.constant 4 : i32
    %103 = arith.index_cast %c4_i32 : i32 to index
    %c0_28 = arith.constant 0 : index
    %c0_29 = arith.constant 0 : index
    %104 = vector.load %arg0[%103, %c0_28, %c0_29] : memref<8x8x512xf32, #tpu.memory_space<vmem>>, vector<1x8x512xf32>
    %105 = vector.shape_cast %104 : vector<1x8x512xf32> to vector<8x512xf32>
    %cst_30 = arith.constant dense<0.000000e+00> : vector<8x512xf32>
    %106 = tpu.matmul %98, %0, %cst_30 {dimension_numbers = #tpu.dot_dimension_numbers<[1], [0], [0], [1], [0, 0, 1, 1], [], []>} : vector<8x128xf32>, vector<128x512xf32>, vector<8x512xf32> -> vector<8x512xf32>
    %107 = arith.addf %105, %106 : vector<8x512xf32>
    %108 = vector.extract_strided_slice %107 {offsets = [0, 0], sizes = [8, 384], strides = [1, 1]} : vector<8x512xf32> to vector<8x384xf32>
    %109 = arith.negf %108 : vector<8x384xf32>
    %110 = math.exp %109 : vector<8x384xf32>
    %cst_31 = arith.constant 1.000000e+00 : f32
    %111 = vector.broadcast %cst_31 : f32 to vector<8x384xf32>
    %112 = arith.addf %111, %110 : vector<8x384xf32>
    %113 = arith.divf %111, %112 : vector<8x384xf32>
    %114 = vector.extract_strided_slice %107 {offsets = [0, 384], sizes = [8, 128], strides = [1, 1]} : vector<8x512xf32> to vector<8x128xf32>
    %115 = math.tanh %114 : vector<8x128xf32>
    %116 = vector.extract_strided_slice %113 {offsets = [0, 0], sizes = [8, 128], strides = [1, 1]} : vector<8x384xf32> to vector<8x128xf32>
    %117 = vector.extract_strided_slice %113 {offsets = [0, 128], sizes = [8, 128], strides = [1, 1]} : vector<8x384xf32> to vector<8x128xf32>
    %118 = vector.extract_strided_slice %113 {offsets = [0, 256], sizes = [8, 128], strides = [1, 1]} : vector<8x384xf32> to vector<8x128xf32>
    %119 = arith.mulf %117, %96 : vector<8x128xf32>
    %120 = arith.mulf %116, %115 : vector<8x128xf32>
    %121 = arith.addf %119, %120 : vector<8x128xf32>
    %122 = math.tanh %121 : vector<8x128xf32>
    %123 = arith.mulf %118, %122 : vector<8x128xf32>
    %124 = arith.index_cast %c4_i32 : i32 to index
    %c0_32 = arith.constant 0 : index
    %c0_33 = arith.constant 0 : index
    %125 = vector.load %arg9[%124, %c0_32, %c0_33] : memref<8x8x128xf32, #tpu.memory_space<vmem>>, vector<1x8x128xf32>
    %126 = vector.shape_cast %125 : vector<1x8x128xf32> to vector<8x128xf32>
    %127 = vector.shape_cast %123 : vector<8x128xf32> to vector<1x8x128xf32>
    tpu.vector_store %arg9[%124, %c0_32, %c0_33], %127 {strides = array<i32>} : memref<8x8x128xf32, #tpu.memory_space<vmem>>, vector<1x8x128xf32>,
    %c5_i32 = arith.constant 5 : i32
    %128 = arith.index_cast %c5_i32 : i32 to index
    %c0_34 = arith.constant 0 : index
    %c0_35 = arith.constant 0 : index
    %129 = vector.load %arg0[%128, %c0_34, %c0_35] : memref<8x8x512xf32, #tpu.memory_space<vmem>>, vector<1x8x512xf32>
    %130 = vector.shape_cast %129 : vector<1x8x512xf32> to vector<8x512xf32>
    %cst_36 = arith.constant dense<0.000000e+00> : vector<8x512xf32>
    %131 = tpu.matmul %123, %0, %cst_36 {dimension_numbers = #tpu.dot_dimension_numbers<[1], [0], [0], [1], [0, 0, 1, 1], [], []>} : vector<8x128xf32>, vector<128x512xf32>, vector<8x512xf32> -> vector<8x512xf32>
    %132 = arith.addf %130, %131 : vector<8x512xf32>
    %133 = vector.extract_strided_slice %132 {offsets = [0, 0], sizes = [8, 384], strides = [1, 1]} : vector<8x512xf32> to vector<8x384xf32>
    %134 = arith.negf %133 : vector<8x384xf32>
    %135 = math.exp %134 : vector<8x384xf32>
    %cst_37 = arith.constant 1.000000e+00 : f32
    %136 = vector.broadcast %cst_37 : f32 to vector<8x384xf32>
    %137 = arith.addf %136, %135 : vector<8x384xf32>
    %138 = arith.divf %136, %137 : vector<8x384xf32>
    %139 = vector.extract_strided_slice %132 {offsets = [0, 384], sizes = [8, 128], strides = [1, 1]} : vector<8x512xf32> to vector<8x128xf32>
    %140 = math.tanh %139 : vector<8x128xf32>
    %141 = vector.extract_strided_slice %138 {offsets = [0, 0], sizes = [8, 128], strides = [1, 1]} : vector<8x384xf32> to vector<8x128xf32>
    %142 = vector.extract_strided_slice %138 {offsets = [0, 128], sizes = [8, 128], strides = [1, 1]} : vector<8x384xf32> to vector<8x128xf32>
    %143 = vector.extract_strided_slice %138 {offsets = [0, 256], sizes = [8, 128], strides = [1, 1]} : vector<8x384xf32> to vector<8x128xf32>
    %144 = arith.mulf %142, %121 : vector<8x128xf32>
    %145 = arith.mulf %141, %140 : vector<8x128xf32>
    %146 = arith.addf %144, %145 : vector<8x128xf32>
    %147 = math.tanh %146 : vector<8x128xf32>
    %148 = arith.mulf %143, %147 : vector<8x128xf32>
    %149 = arith.index_cast %c5_i32 : i32 to index
    %c0_38 = arith.constant 0 : index
    %c0_39 = arith.constant 0 : index
    %150 = vector.load %arg9[%149, %c0_38, %c0_39] : memref<8x8x128xf32, #tpu.memory_space<vmem>>, vector<1x8x128xf32>
    %151 = vector.shape_cast %150 : vector<1x8x128xf32> to vector<8x128xf32>
    %152 = vector.shape_cast %148 : vector<8x128xf32> to vector<1x8x128xf32>
    tpu.vector_store %arg9[%149, %c0_38, %c0_39], %152 {strides = array<i32>} : memref<8x8x128xf32, #tpu.memory_space<vmem>>, vector<1x8x128xf32>,
    %c6_i32 = arith.constant 6 : i32
    %153 = arith.index_cast %c6_i32 : i32 to index
    %c0_40 = arith.constant 0 : index
    %c0_41 = arith.constant 0 : index
    %154 = vector.load %arg0[%153, %c0_40, %c0_41] : memref<8x8x512xf32, #tpu.memory_space<vmem>>, vector<1x8x512xf32>
    %155 = vector.shape_cast %154 : vector<1x8x512xf32> to vector<8x512xf32>
    %cst_42 = arith.constant dense<0.000000e+00> : vector<8x512xf32>
    %156 = tpu.matmul %148, %0, %cst_42 {dimension_numbers = #tpu.dot_dimension_numbers<[1], [0], [0], [1], [0, 0, 1, 1], [], []>} : vector<8x128xf32>, vector<128x512xf32>, vector<8x512xf32> -> vector<8x512xf32>
    %157 = arith.addf %155, %156 : vector<8x512xf32>
    %158 = vector.extract_strided_slice %157 {offsets = [0, 0], sizes = [8, 384], strides = [1, 1]} : vector<8x512xf32> to vector<8x384xf32>
    %159 = arith.negf %158 : vector<8x384xf32>
    %160 = math.exp %159 : vector<8x384xf32>
    %cst_43 = arith.constant 1.000000e+00 : f32
    %161 = vector.broadcast %cst_43 : f32 to vector<8x384xf32>
    %162 = arith.addf %161, %160 : vector<8x384xf32>
    %163 = arith.divf %161, %162 : vector<8x384xf32>
    %164 = vector.extract_strided_slice %157 {offsets = [0, 384], sizes = [8, 128], strides = [1, 1]} : vector<8x512xf32> to vector<8x128xf32>
    %165 = math.tanh %164 : vector<8x128xf32>
    %166 = vector.extract_strided_slice %163 {offsets = [0, 0], sizes = [8, 128], strides = [1, 1]} : vector<8x384xf32> to vector<8x128xf32>
    %167 = vector.extract_strided_slice %163 {offsets = [0, 128], sizes = [8, 128], strides = [1, 1]} : vector<8x384xf32> to vector<8x128xf32>
    %168 = vector.extract_strided_slice %163 {offsets = [0, 256], sizes = [8, 128], strides = [1, 1]} : vector<8x384xf32> to vector<8x128xf32>
    %169 = arith.mulf %167, %146 : vector<8x128xf32>
    %170 = arith.mulf %166, %165 : vector<8x128xf32>
    %171 = arith.addf %169, %170 : vector<8x128xf32>
    %172 = math.tanh %171 : vector<8x128xf32>
    %173 = arith.mulf %168, %172 : vector<8x128xf32>
    %174 = arith.index_cast %c6_i32 : i32 to index
    %c0_44 = arith.constant 0 : index
    %c0_45 = arith.constant 0 : index
    %175 = vector.load %arg9[%174, %c0_44, %c0_45] : memref<8x8x128xf32, #tpu.memory_space<vmem>>, vector<1x8x128xf32>
    %176 = vector.shape_cast %175 : vector<1x8x128xf32> to vector<8x128xf32>
    %177 = vector.shape_cast %173 : vector<8x128xf32> to vector<1x8x128xf32>
    tpu.vector_store %arg9[%174, %c0_44, %c0_45], %177 {strides = array<i32>} : memref<8x8x128xf32, #tpu.memory_space<vmem>>, vector<1x8x128xf32>,
    %c7_i32 = arith.constant 7 : i32
    %178 = arith.index_cast %c7_i32 : i32 to index
    %c0_46 = arith.constant 0 : index
    %c0_47 = arith.constant 0 : index
    %179 = vector.load %arg0[%178, %c0_46, %c0_47] : memref<8x8x512xf32, #tpu.memory_space<vmem>>, vector<1x8x512xf32>
    %180 = vector.shape_cast %179 : vector<1x8x512xf32> to vector<8x512xf32>
    %cst_48 = arith.constant dense<0.000000e+00> : vector<8x512xf32>
    %181 = tpu.matmul %173, %0, %cst_48 {dimension_numbers = #tpu.dot_dimension_numbers<[1], [0], [0], [1], [0, 0, 1, 1], [], []>} : vector<8x128xf32>, vector<128x512xf32>, vector<8x512xf32> -> vector<8x512xf32>
    %182 = arith.addf %180, %181 : vector<8x512xf32>
    %183 = vector.extract_strided_slice %182 {offsets = [0, 0], sizes = [8, 384], strides = [1, 1]} : vector<8x512xf32> to vector<8x384xf32>
    %184 = arith.negf %183 : vector<8x384xf32>
    %185 = math.exp %184 : vector<8x384xf32>
    %cst_49 = arith.constant 1.000000e+00 : f32
    %186 = vector.broadcast %cst_49 : f32 to vector<8x384xf32>
    %187 = arith.addf %186, %185 : vector<8x384xf32>
    %188 = arith.divf %186, %187 : vector<8x384xf32>
    %189 = vector.extract_strided_slice %182 {offsets = [0, 384], sizes = [8, 128], strides = [1, 1]} : vector<8x512xf32> to vector<8x128xf32>
    %190 = math.tanh %189 : vector<8x128xf32>
    %191 = vector.extract_strided_slice %188 {offsets = [0, 0], sizes = [8, 128], strides = [1, 1]} : vector<8x384xf32> to vector<8x128xf32>
    %192 = vector.extract_strided_slice %188 {offsets = [0, 128], sizes = [8, 128], strides = [1, 1]} : vector<8x384xf32> to vector<8x128xf32>
    %193 = vector.extract_strided_slice %188 {offsets = [0, 256], sizes = [8, 128], strides = [1, 1]} : vector<8x384xf32> to vector<8x128xf32>
    %194 = arith.mulf %192, %171 : vector<8x128xf32>
    %195 = arith.mulf %191, %190 : vector<8x128xf32>
    %196 = arith.addf %194, %195 : vector<8x128xf32>
    %197 = math.tanh %196 : vector<8x128xf32>
    %198 = arith.mulf %193, %197 : vector<8x128xf32>
    %199 = arith.index_cast %c7_i32 : i32 to index
    %c0_50 = arith.constant 0 : index
    %c0_51 = arith.constant 0 : index
    %200 = vector.load %arg9[%199, %c0_50, %c0_51] : memref<8x8x128xf32, #tpu.memory_space<vmem>>, vector<1x8x128xf32>
    %201 = vector.shape_cast %200 : vector<1x8x128xf32> to vector<8x128xf32>
    %202 = vector.shape_cast %198 : vector<8x128xf32> to vector<1x8x128xf32>
    tpu.vector_store %arg9[%199, %c0_50, %c0_51], %202 {strides = array<i32>} : memref<8x8x128xf32, #tpu.memory_space<vmem>>, vector<1x8x128xf32>,
    %c8_i32 = arith.constant 8 : i32
    %c0_52 = arith.constant 0 : index
    %c0_53 = arith.constant 0 : index
    %203 = vector.load %arg7[%c0_52, %c0_53] : memref<8x128xf32, #tpu.memory_space<vmem>>, vector<8x128xf32>
    tpu.vector_store %arg7[%c0_52, %c0_53], %198 {strides = array<i32>} : memref<8x128xf32, #tpu.memory_space<vmem>>, vector<8x128xf32>,
    %c0_54 = arith.constant 0 : index
    %c0_55 = arith.constant 0 : index
    %204 = vector.load %arg8[%c0_54, %c0_55] : memref<8x128xf32, #tpu.memory_space<vmem>>, vector<8x128xf32>
    tpu.vector_store %arg8[%c0_54, %c0_55], %196 {strides = array<i32>} : memref<8x128xf32, #tpu.memory_space<vmem>>, vector<8x128xf32>,
    %c0_56 = arith.constant 0 : index
    %c0_57 = arith.constant 0 : index
    %205 = vector.load %arg2[%c0_56, %c0_57] : memref<128x128xf32, #tpu.memory_space<vmem>>, vector<128x128xf32>
    %c0_58 = arith.constant 0 : index
    %c0_59 = arith.constant 0 : index
    %c0_60 = arith.constant 0 : index
    %206 = vector.load %arg9[%c0_58, %c0_59, %c0_60] : memref<8x8x128xf32, #tpu.memory_space<vmem>>, vector<8x8x128xf32>
    %207 = vector.shape_cast %206 : vector<8x8x128xf32> to vector<64x128xf32>
    %cst_61 = arith.constant dense<0.000000e+00> : vector<64x128xf32>
    %208 = tpu.matmul %207, %205, %cst_61 {dimension_numbers = #tpu.dot_dimension_numbers<[1], [0], [0], [1], [0, 0, 1, 1], [], []>} : vector<64x128xf32>, vector<128x128xf32>, vector<64x128xf32> -> vector<64x128xf32>
    %c0_62 = arith.constant 0 : index
    %c0_63 = arith.constant 0 : index
    %209 = vector.load %arg3[%c0_62, %c0_63] : memref<1x128xf32, #tpu.memory_space<vmem>>, vector<1x128xf32>
    %210 = vector.broadcast %209 : vector<1x128xf32> to vector<64x128xf32>
    %211 = arith.addf %208, %210 : vector<64x128xf32>
    %212 = vector.shape_cast %211 : vector<64x128xf32> to vector<8x8x128xf32>
    %c0_64 = arith.constant 0 : index
    %c0_65 = arith.constant 0 : index
    %c0_66 = arith.constant 0 : index
    %213 = vector.load %arg6[%c0_64, %c0_65, %c0_66] : memref<8x8x128xf32, #tpu.memory_space<vmem>>, vector<8x8x128xf32>
    tpu.vector_store %arg6[%c0_64, %c0_65, %c0_66], %212 {strides = array<i32>} : memref<8x8x128xf32, #tpu.memory_space<vmem>>, vector<8x8x128xf32>,
    return
  }
}

</mosaic_0001>

<bundles_post_ra>
// kernel: tpu_custom_call.1
= control target key start
LH: loop header
LB: loop body
LE: loop exit
PB: predicated region body
PF: predicated region fallthrough
CT: control target
= control target key end

     0   :  { %14 = vsyncpa [#allocation4], 0  ;;  %s3210_s0 = inlined_call_operand.hbm [shape: f32[8,8,512], index: 0, kind: input, shape index: {}]   ;;  %s3211_s1 = inlined_call_operand.hbm [shape: f32[128,512], index: 1, kind: input, shape index: {}]   ;;  %s3212_s2 = inlined_call_operand.hbm [shape: f32[128,128], index: 2, kind: input, shape index: {}]   ;;  %s3213_s3 = inlined_call_operand.vmem [shape: f32[1,128], index: 3, kind: input, shape index: {}]   ;;  %s3214_s4 = inlined_call_operand.vmem [shape: f32[8,128], index: 4, kind: input, shape index: {}]   ;;  %s3215_s5 = inlined_call_operand.vmem [shape: f32[8,128], index: 5, kind: input, shape index: {}]   ;;  %s3216_s6 = inlined_call_operand.hbm [shape: f32[8,8,128], index: 6, kind: output, shape index: {0}]   ;;  %s3217_s7 = inlined_call_operand.hbm [shape: f32[8,128], index: 7, kind: output, shape index: {1}]   ;;  %s3218_s8 = inlined_call_operand.hbm [shape: f32[8,128], index: 8, kind: output, shape index: {2}]  }
   0x1   :  { %15 = vsyncpa [#allocation7], 0 }
   0x2   :  { %16 = vsyncpa [#allocation5], 0 }
   0x3   :  { %17 = vsyncpa [#allocation11], 0  ;;  %s2656_s27 = smov [#allocation6]   ;;  %s2657_s29 = smov [#allocation3]  }
   0x4   :  { %s35_s28 = sshll.u32 %s2656_s27, 4  ;;  %s23_s30 = sshll.u32 %s2657_s29, 4  ;;  %s36_s28 = int_to_ptr.vmem [resolvable:$true] %s35_s28  ;;  %s2712_s30 = int_to_ptr.vmem [resolvable:$true] %s23_s30 }
   0x5   :  { %s2516_s11 = scalar_lea.hbm %s3211_s1, 8192 }
   0x6   :  { %p2517_p0 = scmp.ne.s32.totalorder %s3211_s1, %s2516_s11  ;;  %p2520_p1 = scmp.lt.u32.totalorder %s2516_s11, %s3211_s1 }
   0x8   :  { %p2522_p2 = pnand %p2520_p1, %p2517_p0 }
   0xa   :  { %2525 = shalt.err (!%p2522_p2)
}
   0xb   :  { %s2526_s16 = scalar_lea.vmem %s36_s28, 8192  ;;  %p2531_p4 = scmp.lt.s32.totalorder %s36_s28, %s36_s28 }
   0xc   :  { %p2527_p3 = scmp.ne.s32.totalorder %s36_s28, %s2526_s16  ;;  %p2532_p5 = scmp.lt.s32.totalorder %s2526_s16, %s2526_s16 }
   0xe   :  { %p2533_p6 = por %p2532_p5, %p2531_p4 }
  0x10   :  { %p2534_p7 = pnand %p2533_p6, %p2527_p3 }
  0x12   :  { %2537 = shalt.err (!%p2534_p7)
}
  0x13   :  { %s2658_s17 = smov 512   ;;  %s2659_s18 = smov 32  }
  0x14   :  { %41 = dma.hbm_to_vmem [thread:$0]  %s3211_s1, 8192, %s36_s28, [#allocation7], %s2658_s17, %s2658_s17, %s2659_s18  }
  0x15   :  { %s2538_s23 = scalar_lea.hbm %s3210_s0, 4096 }
  0x16   :  { %p2539_p8 = scmp.ne.s32.totalorder %s3210_s0, %s2538_s23  ;;  %p2542_p9 = scmp.lt.u32.totalorder %s2538_s23, %s3210_s0 }
  0x18   :  { %p2544_p10 = pnand %p2542_p9, %p2539_p8 }
  0x1a   :  { %2547 = shalt.err (!%p2544_p10)
}
  0x1b   :  { %s2548_s29 = scalar_lea.vmem %s2712_s30, 4096  ;;  %p2553_p12 = scmp.lt.s32.totalorder %s2712_s30, %s2712_s30 }
  0x1c   :  { %p2549_p11 = scmp.ne.s32.totalorder %s2712_s30, %s2548_s29  ;;  %p2554_p13 = scmp.lt.s32.totalorder %s2548_s29, %s2548_s29 }
  0x1e   :  { %p2555_p0 = por %p2554_p13, %p2553_p12 }
  0x20   :  { %p2556_p1 = pnand %p2555_p0, %p2549_p11 }
  0x22   :  { %2559 = shalt.err (!%p2556_p1)
}
  0x23   :  { %29 = dma.hbm_to_vmem [thread:$0]  %s3210_s0, 4096, %s2712_s30, [#allocation4], %s2658_s17, %s2658_s17, %s2659_s18  }
  0x24   :  { %s2660_s9 = smov [#allocation8]   ;;  %s2560_s13 = scalar_lea.hbm %s3212_s2, 2048 }
  0x25   :  { %s47_s10 = sshll.u32 %s2660_s9, 4  ;;  %p2561_p2 = scmp.ne.s32.totalorder %s3212_s2, %s2560_s13  ;;  %s48_s10 = int_to_ptr.vmem [resolvable:$true] %s47_s10 }
  0x26   :  { %p2564_p3 = scmp.lt.u32.totalorder %s2560_s13, %s3212_s2 }
  0x28   :  { %p2566_p4 = pnand %p2564_p3, %p2561_p2 }
  0x2a   :  { %2569 = shalt.err (!%p2566_p4)
}
  0x2b   :  { %s2570_s20 = scalar_lea.vmem %s48_s10, 2048  ;;  %p2575_p6 = scmp.lt.s32.totalorder %s48_s10, %s48_s10 }
  0x2c   :  { %p2571_p5 = scmp.ne.s32.totalorder %s48_s10, %s2570_s20  ;;  %p2576_p7 = scmp.lt.s32.totalorder %s2570_s20, %s2570_s20 }
  0x2e   :  { %p2577_p8 = por %p2576_p7, %p2575_p6 }
  0x30   :  { %p2578_p9 = pnand %p2577_p8, %p2571_p5 }
  0x32   :  { %2581 = shalt.err (!%p2578_p9)
}
  0x33   :  { %s2661_s0 = smov 128   ;;  %s2662_s30 = smov 8  }
  0x34   :  { %53 = dma.hbm_to_vmem [thread:$0]  %s3212_s2, 2048, %s48_s10, [#allocation7], %s2661_s0, %s2661_s0, %s2662_s30  }
  0x35   :  { %2648 = dma.done.wait [#allocation4], 4096  }
  0x36   :  { %2649 = vsyncadd [#allocation4], 4294963200 }
  0x37   :  { %2650 = dma.done.wait [#allocation7], 10240  }
  0x38   :  { %2651 = vsyncadd [#allocation7], 4294957056  ;;  %v2663_v0 = vmov 0.0   ;;  %v70_v1 = vld [vmem:[#allocation6 + $0x8] sm:$0xff]  ;;  %v69_v3 = vld [vmem:[#allocation6] sm:$0xff] }
  0x39   :  { %203 = vmatprep.mubr.f32.mxu1 %v2663_v0  ;;  %379 = vmatprep.mubr.f32.mxu0 %v2663_v0  ;;  %v74_v2 = vld [vmem:[#allocation6 + $0x28] sm:$0xff]  ;;  %v73_v5 = vld [vmem:[#allocation6 + $0x20] sm:$0xff]  ;;  %v72_v48 = vld [vmem:[#allocation6 + $0x18] sm:$0xff] }
  0x3a   :  { %v2760_v4 = vpack.c.bf16 %v74_v2, %v70_v1  ;;  %v78_v6 = vld [vmem:[#allocation6 + $0x48] sm:$0xff]  ;;  %v2762_v8 = vpack.c.bf16 %v73_v5, %v69_v3  ;;  %v77_v10 = vld [vmem:[#allocation6 + $0x40] sm:$0xff]  ;;  %v76_v49 = vld [vmem:[#allocation6 + $0x38] sm:$0xff] }
  0x3b   :  { %v82_v7 = vld [vmem:[#allocation6 + $0x68] sm:$0xff]  ;;  %v81_v11 = vld [vmem:[#allocation6 + $0x60] sm:$0xff]  ;;  %v2821_v51 = vpack.c.bf16 %v76_v49, %v72_v48  ;;  %v71_v52 = vld [vmem:[#allocation6 + $0x10] sm:$0xff] }
  0x3c   :  { %v2764_v9 = vpack.c.bf16 %v82_v7, %v78_v6  ;;  %v86_v12 = vld [vmem:[#allocation6 + $0x88] sm:$0xff]  ;;  %1834 = vmatprep.subr.bf16.mxu1 %v2760_v4  ;;  %1898 = vmatprep.subr.bf16.mxu0 %v2760_v4  ;;  %v2769_v14 = vpack.c.bf16 %v81_v11, %v77_v10  ;;  %v85_v16 = vld [vmem:[#allocation6 + $0x80] sm:$0xff]  ;;  %v75_v53 = vld [vmem:[#allocation6 + $0x30] sm:$0xff] }
  0x3d   :  { %v90_v13 = vld [vmem:[#allocation6 + $0xa8] sm:$0xff]  ;;  %1836 = vmatpush1.bf16.msra.mxu1 %v2762_v8  ;;  %1900 = vmatpush1.bf16.msra.mxu0 %v2762_v8  ;;  %v89_v17 = vld [vmem:[#allocation6 + $0xa0] sm:$0xff]  ;;  %v80_v54 = vld [vmem:[#allocation6 + $0x58] sm:$0xff]  ;;  %v2828_v57 = vpack.c.bf16 %v75_v53, %v71_v52 }
  0x3e   :  { %1838 = vmatprep.subr.bf16.mxu1 %v2764_v9  ;;  %v2773_v15 = vpack.c.bf16 %v90_v13, %v86_v12  ;;  %1902 = vmatprep.subr.bf16.mxu0 %v2764_v9  ;;  %v94_v18 = vld [vmem:[#allocation6 + $0xc8] sm:$0xff]  ;;  %v2777_v20 = vpack.c.bf16 %v89_v17, %v85_v16  ;;  %v93_v22 = vld [vmem:[#allocation6 + $0xc0] sm:$0xff]  ;;  %v84_v55 = vld [vmem:[#allocation6 + $0x78] sm:$0xff] }
  0x3f   :  { %v98_v19 = vld [vmem:[#allocation6 + $0xe8] sm:$0xff]  ;;  %v97_v23 = vld [vmem:[#allocation6 + $0xe0] sm:$0xff]  ;;  %v2832_v58 = vpack.c.bf16 %v84_v55, %v80_v54  ;;  %v79_v59 = vld [vmem:[#allocation6 + $0x50] sm:$0xff] }
  0x40   :  { %v2781_v21 = vpack.c.bf16 %v98_v19, %v94_v18  ;;  %v102_v24 = vld [vmem:[#allocation6 + $0x108] sm:$0xff]  ;;  %v2785_v26 = vpack.c.bf16 %v97_v23, %v93_v22  ;;  %v101_v28 = vld [vmem:[#allocation6 + $0x100] sm:$0xff]  ;;  %v83_v60 = vld [vmem:[#allocation6 + $0x70] sm:$0xff] }
  0x41   :  { %1840 = vmatpush1.bf16.msra.mxu1 %v2769_v14  ;;  %1904 = vmatpush1.bf16.msra.mxu0 %v2769_v14  ;;  %v106_v25 = vld [vmem:[#allocation6 + $0x128] sm:$0xff]  ;;  %v105_v29 = vld [vmem:[#allocation6 + $0x120] sm:$0xff]  ;;  %v88_v61 = vld [vmem:[#allocation6 + $0x98] sm:$0xff]  ;;  %v2836_v63 = vpack.c.bf16 %v83_v60, %v79_v59 }
  0x42   :  { %1842 = vmatprep.subr.bf16.mxu1 %v2773_v15  ;;  %1906 = vmatprep.subr.bf16.mxu0 %v2773_v15  ;;  %v2789_v27 = vpack.c.bf16 %v106_v25, %v102_v24  ;;  %v110_v30 = vld [vmem:[#allocation6 + $0x148] sm:$0xff]  ;;  %v2793_v32 = vpack.c.bf16 %v105_v29, %v101_v28  ;;  %v109_v34 = vld [vmem:[#allocation6 + $0x140] sm:$0xff]  ;;  %v92_v62 = vld [vmem:[#allocation6 + $0xb8] sm:$0xff] }
  0x43   :  { %v114_v31 = vld [vmem:[#allocation6 + $0x168] sm:$0xff]  ;;  %v113_v35 = vld [vmem:[#allocation6 + $0x160] sm:$0xff]  ;;  %v2840_v1 = vpack.c.bf16 %v92_v62, %v88_v61  ;;  %v87_v2 = vld [vmem:[#allocation6 + $0x90] sm:$0xff] }
  0x44   :  { %v2797_v33 = vpack.c.bf16 %v114_v31, %v110_v30  ;;  %v118_v36 = vld [vmem:[#allocation6 + $0x188] sm:$0xff]  ;;  %v2801_v38 = vpack.c.bf16 %v113_v35, %v109_v34  ;;  %v117_v40 = vld [vmem:[#allocation6 + $0x180] sm:$0xff]  ;;  %v91_v3 = vld [vmem:[#allocation6 + $0xb0] sm:$0xff] }
  0x45   :  { %1844 = vmatpush1.bf16.msra.mxu1 %v2777_v20  ;;  %1908 = vmatpush1.bf16.msra.mxu0 %v2777_v20  ;;  %v122_v37 = vld [vmem:[#allocation6 + $0x1a8] sm:$0xff]  ;;  %v121_v41 = vld [vmem:[#allocation6 + $0x1a0] sm:$0xff]  ;;  %v96_v5 = vld [vmem:[#allocation6 + $0xd8] sm:$0xff]  ;;  %v2843_v7 = vpack.c.bf16 %v91_v3, %v87_v2 }
  0x46   :  { %1846 = vmatprep.subr.bf16.mxu1 %v2781_v21  ;;  %1910 = vmatprep.subr.bf16.mxu0 %v2781_v21  ;;  %v2805_v39 = vpack.c.bf16 %v122_v37, %v118_v36  ;;  %v126_v42 = vld [vmem:[#allocation6 + $0x1c8] sm:$0xff]  ;;  %v2809_v44 = vpack.c.bf16 %v121_v41, %v117_v40  ;;  %v125_v46 = vld [vmem:[#allocation6 + $0x1c0] sm:$0xff]  ;;  %v100_v6 = vld [vmem:[#allocation6 + $0xf8] sm:$0xff] }
  0x47   :  { %v130_v43 = vld [vmem:[#allocation6 + $0x1e8] sm:$0xff]  ;;  %v129_v47 = vld [vmem:[#allocation6 + $0x1e0] sm:$0xff]  ;;  %v2846_v10 = vpack.c.bf16 %v100_v6, %v96_v5  ;;  %v95_v11 = vld [vmem:[#allocation6 + $0xd0] sm:$0xff] }
  0x48   :  { %v2813_v45 = vpack.c.bf16 %v130_v43, %v126_v42  ;;  %v2817_v50 = vpack.c.bf16 %v129_v47, %v125_v46  ;;  %v133_v56 = vld [vmem:[%s3214_s4] sm:$0xff]  ;;  %v99_v12 = vld [vmem:[#allocation6 + $0xf0] sm:$0xff]  ;;  %v104_v13 = vld [vmem:[#allocation6 + $0x118] sm:$0xff] }
  0x49   :  { %1848 = vmatpush1.bf16.msra.mxu1 %v2785_v26  ;;  %1912 = vmatpush1.bf16.msra.mxu0 %v2785_v26  ;;  %v108_v16 = vld [vmem:[#allocation6 + $0x138] sm:$0xff]  ;;  %v2849_v17 = vpack.c.bf16 %v99_v12, %v95_v11  ;;  %v103_v19 = vld [vmem:[#allocation6 + $0x110] sm:$0xff]  ;;  %v136_v54 = vld [vmem:[#allocation3 + $0x8] sm:$0xff] }
  0x4a   :  { %1850 = vmatprep.subr.bf16.mxu1 %v2789_v27  ;;  %1914 = vmatprep.subr.bf16.mxu0 %v2789_v27  ;;  %v2852_v18 = vpack.c.bf16 %v108_v16, %v104_v13  ;;  %v107_v22 = vld [vmem:[#allocation6 + $0x130] sm:$0xff]  ;;  %v112_v23 = vld [vmem:[#allocation6 + $0x158] sm:$0xff]  ;;  %v135_v55 = vld [vmem:[#allocation3] sm:$0xff] }
  0x4b   :  { %v116_v24 = vld [vmem:[#allocation6 + $0x178] sm:$0xff]  ;;  %v2855_v25 = vpack.c.bf16 %v107_v22, %v103_v19  ;;  %v111_v29 = vld [vmem:[#allocation6 + $0x150] sm:$0xff] }
  0x4c   :  { %v2858_v28 = vpack.c.bf16 %v116_v24, %v112_v23  ;;  %v115_v30 = vld [vmem:[#allocation6 + $0x170] sm:$0xff]  ;;  %v120_v31 = vld [vmem:[#allocation6 + $0x198] sm:$0xff]  ;;  %v134_v24 = vld [vmem:[%s3215_s5] sm:$0xff] }
  0x4d   :  { %1852 = vmatpush1.bf16.msra.mxu1 %v2793_v32  ;;  %1916 = vmatpush1.bf16.msra.mxu0 %v2793_v32  ;;  %v124_v34 = vld [vmem:[#allocation6 + $0x1b8] sm:$0xff]  ;;  %v2861_v35 = vpack.c.bf16 %v115_v30, %v111_v29  ;;  %v119_v37 = vld [vmem:[#allocation6 + $0x190] sm:$0xff] }
  0x4e   :  { %1854 = vmatprep.subr.bf16.mxu1 %v2797_v33  ;;  %1918 = vmatprep.subr.bf16.mxu0 %v2797_v33  ;;  %v2864_v36 = vpack.c.bf16 %v124_v34, %v120_v31  ;;  %v123_v40 = vld [vmem:[#allocation6 + $0x1b0] sm:$0xff]  ;;  %v128_v41 = vld [vmem:[#allocation6 + $0x1d8] sm:$0xff] }
  0x4f   :  { %v132_v42 = vld [vmem:[#allocation6 + $0x1f8] sm:$0xff]  ;;  %v2867_v43 = vpack.c.bf16 %v123_v40, %v119_v37  ;;  %v127_v47 = vld [vmem:[#allocation6 + $0x1d0] sm:$0xff] }
  0x50   :  { %v2870_v46 = vpack.c.bf16 %v132_v42, %v128_v41  ;;  %v131_v48 = vld [vmem:[#allocation6 + $0x1f0] sm:$0xff]  ;;  %v138_v11 = vld [vmem:[#allocation3 + $0x18] sm:$0xff] }
  0x51   :  { %1856 = vmatpush1.bf16.msra.mxu1 %v2801_v38  ;;  %1920 = vmatpush1.bf16.msra.mxu0 %v2801_v38  ;;  %v2873_v49 = vpack.c.bf16 %v131_v48, %v127_v47  ;;  %v137_v5 = vld [vmem:[#allocation3 + $0x10] sm:$0xff] }
  0x52   :  { %1858 = vmatprep.subr.bf16.mxu1 %v2805_v39  ;;  %1922 = vmatprep.subr.bf16.mxu0 %v2805_v39 }
  0x55   :  { %1860 = vmatpush1.bf16.msra.mxu1 %v2809_v44  ;;  %1924 = vmatpush1.bf16.msra.mxu0 %v2809_v44 }
  0x56   :  { %1862 = vmatprep.subr.bf16.mxu1 %v2813_v45  ;;  %1926 = vmatprep.subr.bf16.mxu0 %v2813_v45 }
  0x59   :  { %1864 = vmatpush1.bf16.msra.mxu1 %v2817_v50  ;;  %1928 = vmatpush1.bf16.msra.mxu0 %v2817_v50 }
  0x5a   :  { %1866 = vmatprep.subr.bf16.mxu1 %v2821_v51  ;;  %1962 = vmatprep.subr.bf16.mxu0 %v2760_v4 }
  0x5c   :  { %204 = vmatmul.mubr.f32.vlgmr.msra.gmra.mrb[0].mxu1 %v133_v56 }
  0x5d   :  { %1868 = vmatpush1.bf16.msra.mxu1 %v2828_v57  ;;  %274 = vmatprep.mubr.f32.mxu1 %v2663_v0 }
  0x5e   :  { %1870 = vmatprep.subr.bf16.mxu1 %v2832_v58 }
  0x61   :  { %1872 = vmatpush1.bf16.msra.mxu1 %v2836_v63 }
  0x62   :  { %1874 = vmatprep.subr.bf16.mxu1 %v2840_v1 }
  0x65   :  { %1876 = vmatpush1.bf16.msra.mxu1 %v2843_v7 }
  0x66   :  { %1878 = vmatprep.subr.bf16.mxu1 %v2846_v10 }
  0x69   :  { %1880 = vmatpush1.bf16.msra.mxu1 %v2849_v17 }
  0x6a   :  { %1882 = vmatprep.subr.bf16.mxu1 %v2852_v18 }
  0x6d   :  { %1884 = vmatpush1.bf16.msra.mxu1 %v2855_v25 }
  0x6e   :  { %1886 = vmatprep.subr.bf16.mxu1 %v2858_v28 }
  0x71   :  { %1888 = vmatpush1.bf16.msra.mxu1 %v2861_v35 }
  0x72   :  { %1890 = vmatprep.subr.bf16.mxu1 %v2864_v36 }
  0x75   :  { %1892 = vmatpush1.bf16.msra.mxu1 %v2867_v43 }
  0x76   :  { %1894 = vmatprep.subr.bf16.mxu1 %v2870_v46 }
  0x79   :  { %1896 = vmatpush1.bf16.msra.mxu1 %v2873_v49 }
  0x7a   :  { %1930 = vmatprep.subr.bf16.mxu1 %v2821_v51 }
  0x7c   :  { %275 = vmatmul.mubr.f32.vlgmr.msra.gmra.mrb[2].mxu1 %v133_v56 }
  0x7d   :  { %1932 = vmatpush1.bf16.msra.mxu1 %v2828_v57  ;;  %450 = vmatprep.mubr.f32.mxu1 %v2663_v0 }
  0x7e   :  { %1934 = vmatprep.subr.bf16.mxu1 %v2832_v58 }
  0x81   :  { %1936 = vmatpush1.bf16.msra.mxu1 %v2836_v63 }
  0x82   :  { %1938 = vmatprep.subr.bf16.mxu1 %v2840_v1 }
  0x85   :  { %1940 = vmatpush1.bf16.msra.mxu1 %v2843_v7 }
  0x86   :  { %1942 = vmatprep.subr.bf16.mxu1 %v2846_v10 }
  0x89   :  { %1944 = vmatpush1.bf16.msra.mxu1 %v2849_v17 }
  0x8a   :  { %1946 = vmatprep.subr.bf16.mxu1 %v2852_v18 }
  0x8d   :  { %1948 = vmatpush1.bf16.msra.mxu1 %v2855_v25 }
  0x8e   :  { %1950 = vmatprep.subr.bf16.mxu1 %v2858_v28 }
  0x91   :  { %1952 = vmatpush1.bf16.msra.mxu1 %v2861_v35 }
  0x92   :  { %1954 = vmatprep.subr.bf16.mxu1 %v2864_v36 }
  0x95   :  { %1956 = vmatpush1.bf16.msra.mxu1 %v2867_v43 }
  0x96   :  { %1958 = vmatprep.subr.bf16.mxu1 %v2870_v46 }
  0x99   :  { %1960 = vmatpush1.bf16.msra.mxu1 %v2873_v49 }
  0x9a   :  { %1994 = vmatprep.subr.bf16.mxu1 %v2821_v51 }
 0x12f   :  { %v205_v52 = vpop.f32.mrb[0].mxu1 }
 0x130   :  { %v207_v53 = vpop.f32.mrb[1].mxu1  ;;  %v281_v59 = vadd.f32 %v205_v52, %v135_v55  ;;  %v311_v52 = vld [vmem:[#allocation3 + $0x20] sm:$0xff] }
 0x131   :  { %v282_v56 = vadd.f32 %v207_v53, %v136_v54  ;;  %v312_v53 = vld [vmem:[#allocation3 + $0x28] sm:$0xff] }
 0x132   :  { %v1740_v61 = vmul.f32 -1.442695, %v281_v59 }
 0x133   :  { %v1741_v60 = vmul.f32 -1.442695, %v282_v56 }
 0x135   :  { %2388 = vpow2.f32 %v1741_v60 }
 0x136   :  { %2390 = vpow2.f32 %v1740_v61 }
 0x13f   :  { %v2389_v62 = vpop.eup %2388 }
 0x140   :  { %v2391_v2 = vpop.eup %2390  ;;  %v295_v3 = vadd.f32 1.0, %v2389_v62 }
 0x141   :  { %v294_v6 = vadd.f32 1.0, %v2391_v2 }
 0x142   :  { %2392 = vrcp.f32 %v295_v3  ;;  %v313_v3 = vld [vmem:[#allocation3 + $0x30] sm:$0xff] }
 0x143   :  { %2394 = vrcp.f32 %v294_v6  ;;  %v314_v6 = vld [vmem:[#allocation3 + $0x38] sm:$0xff] }
 0x14c   :  { %v2393_v23 = vpop.eup %2392 }
 0x14d   :  { %v2395_v29 = vpop.eup %2394  ;;  %v304_v34 = vmul.f32 %v2393_v23, %v134_v24 }
 0x14f   :  { %v276_v12 = vpop.f32.mrb[2].mxu1 }
 0x150   :  { %v283_v13 = vadd.f32 %v276_v12, %v137_v5  ;;  %v278_v16 = vpop.f32.mrb[3].mxu1 }
 0x151   :  { %v284_v19 = vadd.f32 %v278_v16, %v138_v11 }
 0x152   :  { %v1742_v22 = vmul.f32 -1.442695, %v283_v13 }
 0x153   :  { %2396 = vtanh.f32 %v284_v19 }
 0x154   :  { %2398 = vpow2.f32 %v1742_v22 }
 0x15d   :  { %v2397_v30 = vpop.eup %2396 }
 0x15e   :  { %v2399_v31 = vpop.eup %2398  ;;  %v305_v37 = vmul.f32 %v2397_v30, %v2395_v29 }
 0x15f   :  { %v296_v40 = vadd.f32 1.0, %v2399_v31 }
 0x160   :  { %v2898_v41 = vadd.f32 %v305_v37, %v304_v34 }
 0x161   :  { %2400 = vrcp.f32 %v296_v40 }
 0x162   :  { %2402 = vtanh.f32 %v2898_v41 }
 0x16b   :  { %v2401_v42 = vpop.eup %2400 }
 0x16c   :  { %v2403_v47 = vpop.eup %2402 }
 0x16d   :  { %v2901_v48 = vmul.f32 %v2403_v47, %v2401_v42 }
 0x16f   :  { %380 = vmatmul.mubr.f32.vlgmr.msra.gmra.mrb[0].mxu0 %v2901_v48  ;;  %451 = vmatmul.mubr.f32.vlgmr.msra.gmra.mrb[4].mxu1 %v2901_v48 }
 0x170   :  { %1964 = vmatpush1.bf16.msra.mxu0 %v2762_v8  ;;  %1996 = vmatpush1.bf16.msra.mxu1 %v2828_v57 }
 0x171   :  { %1966 = vmatprep.subr.bf16.mxu0 %v2764_v9  ;;  %1998 = vmatprep.subr.bf16.mxu1 %v2832_v58 }
 0x172   :  { %556 = vmatprep.mubr.f32.mxu0 %v2663_v0  ;;  %627 = vmatprep.mubr.f32.mxu1 %v2663_v0 }
 0x174   :  { %1968 = vmatpush1.bf16.msra.mxu0 %v2769_v14  ;;  %2000 = vmatpush1.bf16.msra.mxu1 %v2836_v63 }
 0x175   :  { %1970 = vmatprep.subr.bf16.mxu0 %v2773_v15  ;;  %2002 = vmatprep.subr.bf16.mxu1 %v2840_v1 }
 0x178   :  { %1972 = vmatpush1.bf16.msra.mxu0 %v2777_v20  ;;  %2004 = vmatpush1.bf16.msra.mxu1 %v2843_v7 }
 0x179   :  { %1974 = vmatprep.subr.bf16.mxu0 %v2781_v21  ;;  %2006 = vmatprep.subr.bf16.mxu1 %v2846_v10 }
 0x17c   :  { %1976 = vmatpush1.bf16.msra.mxu0 %v2785_v26  ;;  %2008 = vmatpush1.bf16.msra.mxu1 %v2849_v17 }
 0x17d   :  { %1978 = vmatprep.subr.bf16.mxu0 %v2789_v27  ;;  %2010 = vmatprep.subr.bf16.mxu1 %v2852_v18 }
 0x180   :  { %1980 = vmatpush1.bf16.msra.mxu0 %v2793_v32  ;;  %2012 = vmatpush1.bf16.msra.mxu1 %v2855_v25 }
 0x181   :  { %1982 = vmatprep.subr.bf16.mxu0 %v2797_v33  ;;  %2014 = vmatprep.subr.bf16.mxu1 %v2858_v28 }
 0x184   :  { %1984 = vmatpush1.bf16.msra.mxu0 %v2801_v38  ;;  %2016 = vmatpush1.bf16.msra.mxu1 %v2861_v35 }
 0x185   :  { %1986 = vmatprep.subr.bf16.mxu0 %v2805_v39  ;;  %2018 = vmatprep.subr.bf16.mxu1 %v2864_v36 }
 0x188   :  { %1988 = vmatpush1.bf16.msra.mxu0 %v2809_v44  ;;  %2020 = vmatpush1.bf16.msra.mxu1 %v2867_v43 }
 0x189   :  { %1990 = vmatprep.subr.bf16.mxu0 %v2813_v45  ;;  %2022 = vmatprep.subr.bf16.mxu1 %v2870_v46 }
 0x18c   :  { %1992 = vmatpush1.bf16.msra.mxu0 %v2817_v50  ;;  %2024 = vmatpush1.bf16.msra.mxu1 %v2873_v49 }
 0x18d   :  { %2026 = vmatprep.subr.bf16.mxu0 %v2760_v4  ;;  %2058 = vmatprep.subr.bf16.mxu1 %v2821_v51 }
 0x242   :  { %v381_v54 = vpop.f32.mrb[0].mxu0  ;;  %v452_v55 = vpop.f32.mrb[4].mxu1 }
 0x243   :  { %v457_v56 = vadd.f32 %v381_v54, %v311_v52  ;;  %v383_v59 = vpop.f32.mrb[1].mxu0  ;;  %v454_v60 = vpop.f32.mrb[5].mxu1  ;;  %v459_v5 = vadd.f32 %v452_v55, %v313_v3  ;;  %v490_v3 = vld [vmem:[#allocation3 + $0x50] sm:$0xff] }
 0x244   :  { %v458_v61 = vadd.f32 %v383_v59, %v312_v53  ;;  %v460_v11 = vadd.f32 %v454_v60, %v314_v6  ;;  %v489_v53 = vld [vmem:[#allocation3 + $0x48] sm:$0xff]  ;;  %v491_v6 = vld [vmem:[#allocation3 + $0x58] sm:$0xff] }
 0x245   :  { %v1743_v62 = vmul.f32 -1.442695, %v457_v56  ;;  %v1745_v12 = vmul.f32 -1.442695, %v459_v5 }
 0x246   :  { %v1744_v2 = vmul.f32 -1.442695, %v458_v61 }
 0x247   :  { %2404 = vpow2.f32 %v1743_v62 }
 0x248   :  { %2406 = vpow2.f32 %v1744_v2 }
 0x249   :  { %2408 = vtanh.f32 %v460_v11 }
 0x24a   :  { %2410 = vpow2.f32 %v1745_v12 }
 0x251   :  { %v2405_v13 = vpop.eup %2404 }
 0x252   :  { %v470_v16 = vadd.f32 1.0, %v2405_v13  ;;  %v2407_v19 = vpop.eup %2406 }
 0x253   :  { %v471_v22 = vadd.f32 1.0, %v2407_v19  ;;  %v2409_v23 = vpop.eup %2408 }
 0x254   :  { %2412 = vrcp.f32 %v470_v16  ;;  %v2411_v24 = vpop.eup %2410 }
 0x255   :  { %2414 = vrcp.f32 %v471_v22  ;;  %v472_v34 = vadd.f32 1.0, %v2411_v24 }
 0x257   :  { %2416 = vrcp.f32 %v472_v34 }
 0x25e   :  { %v2413_v29 = vpop.eup %2412 }
 0x25f   :  { %v481_v30 = vmul.f32 %v2413_v29, %v2409_v23  ;;  %v2415_v31 = vpop.eup %2414 }
 0x260   :  { %v480_v37 = vmul.f32 %v2415_v31, %v2898_v41  ;;  %v488_v41 = vld [vmem:[#allocation3 + $0x40] sm:$0xff] }
 0x261   :  { %v2417_v42 = vpop.eup %2416 }
 0x262   :  { %v2940_v40 = vadd.f32 %v481_v30, %v480_v37 }
 0x264   :  { %2418 = vtanh.f32 %v2940_v40 }
 0x26e   :  { %v2419_v47 = vpop.eup %2418 }
 0x26f   :  { %v2943_v52 = vmul.f32 %v2419_v47, %v2417_v42 }
 0x271   :  { %557 = vmatmul.mubr.f32.vlgmr.msra.gmra.mrb[2].mxu0 %v2943_v52  ;;  %628 = vmatmul.mubr.f32.vlgmr.msra.gmra.mrb[6].mxu1 %v2943_v52 }
 0x272   :  { %2028 = vmatpush1.bf16.msra.mxu0 %v2762_v8  ;;  %2060 = vmatpush1.bf16.msra.mxu1 %v2828_v57 }
 0x273   :  { %2030 = vmatprep.subr.bf16.mxu0 %v2764_v9  ;;  %2062 = vmatprep.subr.bf16.mxu1 %v2832_v58 }
 0x274   :  { %733 = vmatprep.mubr.f32.mxu0 %v2663_v0  ;;  %804 = vmatprep.mubr.f32.mxu1 %v2663_v0 }
 0x276   :  { %2032 = vmatpush1.bf16.msra.mxu0 %v2769_v14  ;;  %2064 = vmatpush1.bf16.msra.mxu1 %v2836_v63 }
 0x277   :  { %2034 = vmatprep.subr.bf16.mxu0 %v2773_v15  ;;  %2066 = vmatprep.subr.bf16.mxu1 %v2840_v1 }
 0x27a   :  { %2036 = vmatpush1.bf16.msra.mxu0 %v2777_v20  ;;  %2068 = vmatpush1.bf16.msra.mxu1 %v2843_v7 }
 0x27b   :  { %2038 = vmatprep.subr.bf16.mxu0 %v2781_v21  ;;  %2070 = vmatprep.subr.bf16.mxu1 %v2846_v10 }
 0x27e   :  { %2040 = vmatpush1.bf16.msra.mxu0 %v2785_v26  ;;  %2072 = vmatpush1.bf16.msra.mxu1 %v2849_v17 }
 0x27f   :  { %2042 = vmatprep.subr.bf16.mxu0 %v2789_v27  ;;  %2074 = vmatprep.subr.bf16.mxu1 %v2852_v18 }
 0x282   :  { %2044 = vmatpush1.bf16.msra.mxu0 %v2793_v32  ;;  %2076 = vmatpush1.bf16.msra.mxu1 %v2855_v25 }
 0x283   :  { %2046 = vmatprep.subr.bf16.mxu0 %v2797_v33  ;;  %2078 = vmatprep.subr.bf16.mxu1 %v2858_v28 }
 0x286   :  { %2048 = vmatpush1.bf16.msra.mxu0 %v2801_v38  ;;  %2080 = vmatpush1.bf16.msra.mxu1 %v2861_v35 }
 0x287   :  { %2050 = vmatprep.subr.bf16.mxu0 %v2805_v39  ;;  %2082 = vmatprep.subr.bf16.mxu1 %v2864_v36 }
 0x28a   :  { %2052 = vmatpush1.bf16.msra.mxu0 %v2809_v44  ;;  %2084 = vmatpush1.bf16.msra.mxu1 %v2867_v43 }
 0x28b   :  { %2054 = vmatprep.subr.bf16.mxu0 %v2813_v45  ;;  %2086 = vmatprep.subr.bf16.mxu1 %v2870_v46 }
 0x28e   :  { %2056 = vmatpush1.bf16.msra.mxu0 %v2817_v50  ;;  %2088 = vmatpush1.bf16.msra.mxu1 %v2873_v49 }
 0x28f   :  { %2090 = vmatprep.subr.bf16.mxu0 %v2760_v4  ;;  %2122 = vmatprep.subr.bf16.mxu1 %v2821_v51 }
 0x344   :  { %v558_v54 = vpop.f32.mrb[2].mxu0  ;;  %v629_v55 = vpop.f32.mrb[6].mxu1 }
 0x345   :  { %v634_v56 = vadd.f32 %v558_v54, %v488_v41  ;;  %v560_v59 = vpop.f32.mrb[3].mxu0  ;;  %v631_v60 = vpop.f32.mrb[7].mxu1  ;;  %v636_v5 = vadd.f32 %v629_v55, %v490_v3  ;;  %v666_v54 = vld [vmem:[#allocation3 + $0x68] sm:$0xff] }
 0x346   :  { %v635_v61 = vadd.f32 %v560_v59, %v489_v53  ;;  %v637_v11 = vadd.f32 %v631_v60, %v491_v6 }
 0x347   :  { %v1746_v62 = vmul.f32 -1.442695, %v634_v56  ;;  %v1748_v12 = vmul.f32 -1.442695, %v636_v5  ;;  %v667_v5 = vld [vmem:[#allocation3 + $0x70] sm:$0xff] }
 0x348   :  { %v1747_v2 = vmul.f32 -1.442695, %v635_v61 }
 0x349   :  { %2420 = vpow2.f32 %v1746_v62 }
 0x34a   :  { %2422 = vpow2.f32 %v1747_v2 }
 0x34b   :  { %2424 = vtanh.f32 %v637_v11  ;;  %v668_v11 = vld [vmem:[#allocation3 + $0x78] sm:$0xff] }
 0x34c   :  { %2426 = vpow2.f32 %v1748_v12 }
 0x353   :  { %v2421_v13 = vpop.eup %2420 }
 0x354   :  { %v647_v16 = vadd.f32 1.0, %v2421_v13  ;;  %v2423_v19 = vpop.eup %2422 }
 0x355   :  { %v648_v22 = vadd.f32 1.0, %v2423_v19  ;;  %v2425_v23 = vpop.eup %2424 }
 0x356   :  { %2428 = vrcp.f32 %v647_v16  ;;  %v2427_v24 = vpop.eup %2426 }
 0x357   :  { %2430 = vrcp.f32 %v648_v22  ;;  %v649_v34 = vadd.f32 1.0, %v2427_v24 }
 0x359   :  { %2432 = vrcp.f32 %v649_v34 }
 0x360   :  { %v2429_v29 = vpop.eup %2428 }
 0x361   :  { %v658_v30 = vmul.f32 %v2429_v29, %v2425_v23  ;;  %v2431_v31 = vpop.eup %2430 }
 0x362   :  { %v657_v37 = vmul.f32 %v2431_v31, %v2940_v40  ;;  %v665_v40 = vld [vmem:[#allocation3 + $0x60] sm:$0xff] }
 0x363   :  { %v2433_v47 = vpop.eup %2432 }
 0x364   :  { %v2982_v42 = vadd.f32 %v658_v30, %v657_v37 }
 0x366   :  { %2434 = vtanh.f32 %v2982_v42 }
 0x370   :  { %v2435_v41 = vpop.eup %2434 }
 0x371   :  { %v2985_v53 = vmul.f32 %v2435_v41, %v2433_v47 }
 0x373   :  { %734 = vmatmul.mubr.f32.vlgmr.msra.gmra.mrb[4].mxu0 %v2985_v53  ;;  %805 = vmatmul.mubr.f32.vlgmr.msra.gmra.mrb[8].mxu1 %v2985_v53 }
 0x374   :  { %2092 = vmatpush1.bf16.msra.mxu0 %v2762_v8  ;;  %2124 = vmatpush1.bf16.msra.mxu1 %v2828_v57 }
 0x375   :  { %2094 = vmatprep.subr.bf16.mxu0 %v2764_v9  ;;  %2126 = vmatprep.subr.bf16.mxu1 %v2832_v58 }
 0x376   :  { %910 = vmatprep.mubr.f32.mxu0 %v2663_v0  ;;  %981 = vmatprep.mubr.f32.mxu1 %v2663_v0 }
 0x378   :  { %2096 = vmatpush1.bf16.msra.mxu0 %v2769_v14  ;;  %2128 = vmatpush1.bf16.msra.mxu1 %v2836_v63 }
 0x379   :  { %2098 = vmatprep.subr.bf16.mxu0 %v2773_v15  ;;  %2130 = vmatprep.subr.bf16.mxu1 %v2840_v1 }
 0x37c   :  { %2100 = vmatpush1.bf16.msra.mxu0 %v2777_v20  ;;  %2132 = vmatpush1.bf16.msra.mxu1 %v2843_v7 }
 0x37d   :  { %2102 = vmatprep.subr.bf16.mxu0 %v2781_v21  ;;  %2134 = vmatprep.subr.bf16.mxu1 %v2846_v10 }
 0x380   :  { %2104 = vmatpush1.bf16.msra.mxu0 %v2785_v26  ;;  %2136 = vmatpush1.bf16.msra.mxu1 %v2849_v17 }
 0x381   :  { %2106 = vmatprep.subr.bf16.mxu0 %v2789_v27  ;;  %2138 = vmatprep.subr.bf16.mxu1 %v2852_v18 }
 0x384   :  { %2108 = vmatpush1.bf16.msra.mxu0 %v2793_v32  ;;  %2140 = vmatpush1.bf16.msra.mxu1 %v2855_v25 }
 0x385   :  { %2110 = vmatprep.subr.bf16.mxu0 %v2797_v33  ;;  %2142 = vmatprep.subr.bf16.mxu1 %v2858_v28 }
 0x388   :  { %2112 = vmatpush1.bf16.msra.mxu0 %v2801_v38  ;;  %2144 = vmatpush1.bf16.msra.mxu1 %v2861_v35 }
 0x389   :  { %2114 = vmatprep.subr.bf16.mxu0 %v2805_v39  ;;  %2146 = vmatprep.subr.bf16.mxu1 %v2864_v36 }
 0x38c   :  { %2116 = vmatpush1.bf16.msra.mxu0 %v2809_v44  ;;  %2148 = vmatpush1.bf16.msra.mxu1 %v2867_v43 }
 0x38d   :  { %2118 = vmatprep.subr.bf16.mxu0 %v2813_v45  ;;  %2150 = vmatprep.subr.bf16.mxu1 %v2870_v46 }
 0x390   :  { %2120 = vmatpush1.bf16.msra.mxu0 %v2817_v50  ;;  %2152 = vmatpush1.bf16.msra.mxu1 %v2873_v49 }
 0x391   :  { %2154 = vmatprep.subr.bf16.mxu0 %v2760_v4  ;;  %2186 = vmatprep.subr.bf16.mxu1 %v2821_v51 }
 0x446   :  { %v735_v55 = vpop.f32.mrb[4].mxu0  ;;  %v806_v56 = vpop.f32.mrb[8].mxu1 }
 0x447   :  { %v811_v59 = vadd.f32 %v735_v55, %v665_v40  ;;  %v737_v60 = vpop.f32.mrb[5].mxu0  ;;  %v808_v61 = vpop.f32.mrb[9].mxu1  ;;  %v813_v6 = vadd.f32 %v806_v56, %v667_v5  ;;  %v843_v56 = vld [vmem:[#allocation3 + $0x88] sm:$0xff] }
 0x448   :  { %v812_v62 = vadd.f32 %v737_v60, %v666_v54  ;;  %v814_v12 = vadd.f32 %v808_v61, %v668_v11  ;;  %v844_v11 = vld [vmem:[#allocation3 + $0x90] sm:$0xff] }
 0x449   :  { %v1749_v2 = vmul.f32 -1.442695, %v811_v59  ;;  %v1751_v13 = vmul.f32 -1.442695, %v813_v6 }
 0x44a   :  { %v1750_v3 = vmul.f32 -1.442695, %v812_v62 }
 0x44b   :  { %2436 = vpow2.f32 %v1749_v2 }
 0x44c   :  { %2438 = vpow2.f32 %v1750_v3 }
 0x44d   :  { %2440 = vtanh.f32 %v814_v12 }
 0x44e   :  { %2442 = vpow2.f32 %v1751_v13  ;;  %v845_v13 = vld [vmem:[#allocation3 + $0x98] sm:$0xff] }
 0x455   :  { %v2437_v16 = vpop.eup %2436 }
 0x456   :  { %v824_v19 = vadd.f32 1.0, %v2437_v16  ;;  %v2439_v22 = vpop.eup %2438 }
 0x457   :  { %v825_v23 = vadd.f32 1.0, %v2439_v22  ;;  %v2441_v24 = vpop.eup %2440 }
 0x458   :  { %2444 = vrcp.f32 %v824_v19  ;;  %v2443_v29 = vpop.eup %2442 }
 0x459   :  { %2446 = vrcp.f32 %v825_v23  ;;  %v826_v37 = vadd.f32 1.0, %v2443_v29 }
 0x45b   :  { %2448 = vrcp.f32 %v826_v37 }
 0x462   :  { %v2445_v30 = vpop.eup %2444 }
 0x463   :  { %v835_v31 = vmul.f32 %v2445_v30, %v2441_v24  ;;  %v2447_v34 = vpop.eup %2446 }
 0x464   :  { %v834_v47 = vmul.f32 %v2447_v34, %v2982_v42  ;;  %v842_v42 = vld [vmem:[#allocation3 + $0x80] sm:$0xff] }
 0x465   :  { %v2449_v40 = vpop.eup %2448 }
 0x466   :  { %v3024_v41 = vadd.f32 %v835_v31, %v834_v47 }
 0x468   :  { %2450 = vtanh.f32 %v3024_v41 }
 0x472   :  { %v2451_v54 = vpop.eup %2450 }
 0x473   :  { %v3027_v55 = vmul.f32 %v2451_v54, %v2449_v40 }
 0x475   :  { %911 = vmatmul.mubr.f32.vlgmr.msra.gmra.mrb[6].mxu0 %v3027_v55  ;;  %982 = vmatmul.mubr.f32.vlgmr.msra.gmra.mrb[10].mxu1 %v3027_v55 }
 0x476   :  { %2156 = vmatpush1.bf16.msra.mxu0 %v2762_v8  ;;  %2188 = vmatpush1.bf16.msra.mxu1 %v2828_v57 }
 0x477   :  { %2158 = vmatprep.subr.bf16.mxu0 %v2764_v9  ;;  %2190 = vmatprep.subr.bf16.mxu1 %v2832_v58 }
 0x478   :  { %1087 = vmatprep.mubr.f32.mxu0 %v2663_v0  ;;  %1158 = vmatprep.mubr.f32.mxu1 %v2663_v0 }
 0x47a   :  { %2160 = vmatpush1.bf16.msra.mxu0 %v2769_v14  ;;  %2192 = vmatpush1.bf16.msra.mxu1 %v2836_v63 }
 0x47b   :  { %2162 = vmatprep.subr.bf16.mxu0 %v2773_v15  ;;  %2194 = vmatprep.subr.bf16.mxu1 %v2840_v1 }
 0x47e   :  { %2164 = vmatpush1.bf16.msra.mxu0 %v2777_v20  ;;  %2196 = vmatpush1.bf16.msra.mxu1 %v2843_v7 }
 0x47f   :  { %2166 = vmatprep.subr.bf16.mxu0 %v2781_v21  ;;  %2198 = vmatprep.subr.bf16.mxu1 %v2846_v10 }
 0x482   :  { %2168 = vmatpush1.bf16.msra.mxu0 %v2785_v26  ;;  %2200 = vmatpush1.bf16.msra.mxu1 %v2849_v17 }
 0x483   :  { %2170 = vmatprep.subr.bf16.mxu0 %v2789_v27  ;;  %2202 = vmatprep.subr.bf16.mxu1 %v2852_v18 }
 0x486   :  { %2172 = vmatpush1.bf16.msra.mxu0 %v2793_v32  ;;  %2204 = vmatpush1.bf16.msra.mxu1 %v2855_v25 }
 0x487   :  { %2174 = vmatprep.subr.bf16.mxu0 %v2797_v33  ;;  %2206 = vmatprep.subr.bf16.mxu1 %v2858_v28 }
 0x48a   :  { %2176 = vmatpush1.bf16.msra.mxu0 %v2801_v38  ;;  %2208 = vmatpush1.bf16.msra.mxu1 %v2861_v35 }
 0x48b   :  { %2178 = vmatprep.subr.bf16.mxu0 %v2805_v39  ;;  %2210 = vmatprep.subr.bf16.mxu1 %v2864_v36 }
 0x48e   :  { %2180 = vmatpush1.bf16.msra.mxu0 %v2809_v44  ;;  %2212 = vmatpush1.bf16.msra.mxu1 %v2867_v43 }
 0x48f   :  { %2182 = vmatprep.subr.bf16.mxu0 %v2813_v45  ;;  %2214 = vmatprep.subr.bf16.mxu1 %v2870_v46 }
 0x492   :  { %2184 = vmatpush1.bf16.msra.mxu0 %v2817_v50  ;;  %2216 = vmatpush1.bf16.msra.mxu1 %v2873_v49 }
 0x493   :  { %2218 = vmatprep.subr.bf16.mxu0 %v2760_v4  ;;  %2250 = vmatprep.subr.bf16.mxu1 %v2821_v51 }
 0x548   :  { %v912_v59 = vpop.f32.mrb[6].mxu0  ;;  %v983_v60 = vpop.f32.mrb[10].mxu1 }
 0x549   :  { %v988_v61 = vadd.f32 %v912_v59, %v842_v42  ;;  %v914_v62 = vpop.f32.mrb[7].mxu0  ;;  %v985_v2 = vpop.f32.mrb[11].mxu1  ;;  %v990_v12 = vadd.f32 %v983_v60, %v844_v11 }
 0x54a   :  { %v989_v3 = vadd.f32 %v914_v62, %v843_v56  ;;  %v991_v16 = vadd.f32 %v985_v2, %v845_v13 }
 0x54b   :  { %v1752_v5 = vmul.f32 -1.442695, %v988_v61  ;;  %v1754_v19 = vmul.f32 -1.442695, %v990_v12  ;;  %v1020_v61 = vld [vmem:[#allocation3 + $0xa8] sm:$0xff] }
 0x54c   :  { %v1753_v6 = vmul.f32 -1.442695, %v989_v3 }
 0x54d   :  { %2452 = vpow2.f32 %v1752_v5 }
 0x54e   :  { %2454 = vpow2.f32 %v1753_v6 }
 0x54f   :  { %2456 = vtanh.f32 %v991_v16  ;;  %v1021_v16 = vld [vmem:[#allocation3 + $0xb0] sm:$0xff] }
 0x550   :  { %2458 = vpow2.f32 %v1754_v19 }
 0x557   :  { %v2453_v22 = vpop.eup %2452 }
 0x558   :  { %v1001_v23 = vadd.f32 1.0, %v2453_v22  ;;  %v2455_v24 = vpop.eup %2454  ;;  %v1022_v22 = vld [vmem:[#allocation3 + $0xb8] sm:$0xff] }
 0x559   :  { %v1002_v29 = vadd.f32 1.0, %v2455_v24  ;;  %v2457_v30 = vpop.eup %2456 }
 0x55a   :  { %2460 = vrcp.f32 %v1001_v23  ;;  %v2459_v31 = vpop.eup %2458 }
 0x55b   :  { %2462 = vrcp.f32 %v1002_v29  ;;  %v1003_v40 = vadd.f32 1.0, %v2459_v31 }
 0x55d   :  { %2464 = vrcp.f32 %v1003_v40 }
 0x564   :  { %v2461_v34 = vpop.eup %2460 }
 0x565   :  { %v1012_v37 = vmul.f32 %v2461_v34, %v2457_v30  ;;  %v2463_v47 = vpop.eup %2462 }
 0x566   :  { %v1011_v54 = vmul.f32 %v2463_v47, %v3024_v41  ;;  %v1019_v41 = vld [vmem:[#allocation3 + $0xa0] sm:$0xff] }
 0x567   :  { %v2465_v56 = vpop.eup %2464 }
 0x568   :  { %v3066_v42 = vadd.f32 %v1012_v37, %v1011_v54 }
 0x56a   :  { %2466 = vtanh.f32 %v3066_v42 }
 0x574   :  { %v2467_v59 = vpop.eup %2466 }
 0x575   :  { %v3069_v60 = vmul.f32 %v2467_v59, %v2465_v56 }
 0x577   :  { %1088 = vmatmul.mubr.f32.vlgmr.msra.gmra.mrb[8].mxu0 %v3069_v60  ;;  %1159 = vmatmul.mubr.f32.vlgmr.msra.gmra.mrb[12].mxu1 %v3069_v60 }
 0x578   :  { %2220 = vmatpush1.bf16.msra.mxu0 %v2762_v8  ;;  %2252 = vmatpush1.bf16.msra.mxu1 %v2828_v57 }
 0x579   :  { %2222 = vmatprep.subr.bf16.mxu0 %v2764_v9  ;;  %2254 = vmatprep.subr.bf16.mxu1 %v2832_v58 }
 0x57a   :  { %1264 = vmatprep.mubr.f32.mxu0 %v2663_v0  ;;  %1335 = vmatprep.mubr.f32.mxu1 %v2663_v0 }
 0x57c   :  { %2224 = vmatpush1.bf16.msra.mxu0 %v2769_v14  ;;  %2256 = vmatpush1.bf16.msra.mxu1 %v2836_v63 }
 0x57d   :  { %2226 = vmatprep.subr.bf16.mxu0 %v2773_v15  ;;  %2258 = vmatprep.subr.bf16.mxu1 %v2840_v1 }
 0x580   :  { %2228 = vmatpush1.bf16.msra.mxu0 %v2777_v20  ;;  %2260 = vmatpush1.bf16.msra.mxu1 %v2843_v7 }
 0x581   :  { %2230 = vmatprep.subr.bf16.mxu0 %v2781_v21  ;;  %2262 = vmatprep.subr.bf16.mxu1 %v2846_v10 }
 0x584   :  { %2232 = vmatpush1.bf16.msra.mxu0 %v2785_v26  ;;  %2264 = vmatpush1.bf16.msra.mxu1 %v2849_v17 }
 0x585   :  { %2234 = vmatprep.subr.bf16.mxu0 %v2789_v27  ;;  %2266 = vmatprep.subr.bf16.mxu1 %v2852_v18 }
 0x588   :  { %2236 = vmatpush1.bf16.msra.mxu0 %v2793_v32  ;;  %2268 = vmatpush1.bf16.msra.mxu1 %v2855_v25 }
 0x589   :  { %2238 = vmatprep.subr.bf16.mxu0 %v2797_v33  ;;  %2270 = vmatprep.subr.bf16.mxu1 %v2858_v28 }
 0x58c   :  { %2240 = vmatpush1.bf16.msra.mxu0 %v2801_v38  ;;  %2272 = vmatpush1.bf16.msra.mxu1 %v2861_v35 }
 0x58d   :  { %2242 = vmatprep.subr.bf16.mxu0 %v2805_v39  ;;  %2274 = vmatprep.subr.bf16.mxu1 %v2864_v36 }
 0x590   :  { %2244 = vmatpush1.bf16.msra.mxu0 %v2809_v44  ;;  %2276 = vmatpush1.bf16.msra.mxu1 %v2867_v43 }
 0x591   :  { %2246 = vmatprep.subr.bf16.mxu0 %v2813_v45  ;;  %2278 = vmatprep.subr.bf16.mxu1 %v2870_v46 }
 0x594   :  { %2248 = vmatpush1.bf16.msra.mxu0 %v2817_v50  ;;  %2280 = vmatpush1.bf16.msra.mxu1 %v2873_v49 }
 0x595   :  { %2282 = vmatprep.subr.bf16.mxu0 %v2760_v4  ;;  %2314 = vmatprep.subr.bf16.mxu1 %v2821_v51 }
 0x64a   :  { %v1089_v62 = vpop.f32.mrb[8].mxu0  ;;  %v1160_v2 = vpop.f32.mrb[12].mxu1 }
 0x64b   :  { %v1165_v3 = vadd.f32 %v1089_v62, %v1019_v41  ;;  %v1091_v5 = vpop.f32.mrb[9].mxu0  ;;  %v1162_v6 = vpop.f32.mrb[13].mxu1  ;;  %v1167_v19 = vadd.f32 %v1160_v2, %v1021_v16  ;;  %v1557_v16 = vld [vmem:[#allocation8 + $0x30] sm:$0xff] }
 0x64c   :  { %v1166_v11 = vadd.f32 %v1091_v5, %v1020_v61  ;;  %v1168_v23 = vadd.f32 %v1162_v6, %v1022_v22 }
 0x64d   :  { %v1755_v12 = vmul.f32 -1.442695, %v1165_v3  ;;  %v1757_v24 = vmul.f32 -1.442695, %v1167_v19  ;;  %v1558_v19 = vld [vmem:[#allocation8 + $0x38] sm:$0xff] }
 0x64e   :  { %v1756_v13 = vmul.f32 -1.442695, %v1166_v11  ;;  %v1555_v11 = vld [vmem:[#allocation8 + $0x20] sm:$0xff]  ;;  %v2357_v22 = vpack.c.bf16 %v1558_v19, %v1557_v16 }
 0x64f   :  { %2468 = vpow2.f32 %v1755_v12  ;;  %v1556_v12 = vld [vmem:[#allocation8 + $0x28] sm:$0xff] }
 0x650   :  { %2470 = vpow2.f32 %v1756_v13  ;;  %v2353_v13 = vpack.c.bf16 %v1556_v12, %v1555_v11 }
 0x651   :  { %2472 = vtanh.f32 %v1168_v23  ;;  %v1559_v23 = vld [vmem:[#allocation8 + $0x40] sm:$0xff] }
 0x652   :  { %2474 = vpow2.f32 %v1757_v24  ;;  %v1560_v24 = vld [vmem:[#allocation8 + $0x48] sm:$0xff] }
 0x659   :  { %v2469_v4 = vpop.eup %2468 }
 0x65a   :  { %v1178_v29 = vadd.f32 1.0, %v2469_v4  ;;  %v2471_v51 = vpop.eup %2470  ;;  %v2361_v4 = vpack.c.bf16 %v1560_v24, %v1559_v23 }
 0x65b   :  { %v1179_v30 = vadd.f32 1.0, %v2471_v51  ;;  %v2473_v31 = vpop.eup %2472  ;;  %v1562_v51 = vld [vmem:[#allocation8 + $0x58] sm:$0xff] }
 0x65c   :  { %2476 = vrcp.f32 %v1178_v29  ;;  %v2475_v34 = vpop.eup %2474  ;;  %v1561_v29 = vld [vmem:[#allocation8 + $0x50] sm:$0xff] }
 0x65d   :  { %2478 = vrcp.f32 %v1179_v30  ;;  %v1180_v54 = vadd.f32 1.0, %v2475_v34  ;;  %v2365_v30 = vpack.c.bf16 %v1562_v51, %v1561_v29  ;;  %v1564_v34 = vld [vmem:[#allocation8 + $0x68] sm:$0xff] }
 0x65f   :  { %2480 = vrcp.f32 %v1180_v54  ;;  %v1373_v54 = vld [vmem:[#allocation3 + $0xe0] sm:$0xff] }
 0x666   :  { %v2477_v37 = vpop.eup %2476 }
 0x667   :  { %v1189_v47 = vmul.f32 %v2477_v37, %v2473_v31  ;;  %v2479_v40 = vpop.eup %2478  ;;  %v1563_v31 = vld [vmem:[#allocation8 + $0x60] sm:$0xff]  ;;  %v1565_v37 = vld [vmem:[#allocation8 + $0x70] sm:$0xff] }
 0x668   :  { %v1188_v56 = vmul.f32 %v2479_v40, %v3066_v42  ;;  %v1554_v42 = vld [vmem:[#allocation8 + $0x18] sm:$0xff] }
 0x669   :  { %v2481_v41 = vpop.eup %2480 }
 0x66a   :  { %v3108_v59 = vadd.f32 %v1189_v47, %v1188_v56  ;;  %v1566_v47 = vld [vmem:[#allocation8 + $0x78] sm:$0xff]  ;;  %v1374_v56 = vld [vmem:[#allocation3 + $0xe8] sm:$0xff] }
 0x66b   :  { %v2373_v40 = vpack.c.bf16 %v1566_v47, %v1565_v37 }
 0x66c   :  { %2482 = vtanh.f32 %v3108_v59 }
 0x676   :  { %v2483_v61 = vpop.eup %2482 }
 0x677   :  { %v3111_v62 = vmul.f32 %v2483_v61, %v2481_v41 }
 0x679   :  { %1265 = vmatmul.mubr.f32.vlgmr.msra.gmra.mrb[10].mxu0 %v3111_v62  ;;  %1336 = vmatmul.mubr.f32.vlgmr.msra.gmra.mrb[14].mxu1 %v3111_v62 }
 0x67a   :  { %2284 = vmatpush1.bf16.msra.mxu0 %v2762_v8  ;;  %2316 = vmatpush1.bf16.msra.mxu1 %v2828_v57  ;;  %v1552_v8 = vld [vmem:[#allocation8 + $0x8] sm:$0xff] }
 0x67b   :  { %2286 = vmatprep.subr.bf16.mxu0 %v2764_v9  ;;  %2318 = vmatprep.subr.bf16.mxu1 %v2832_v58 }
 0x67c   :  { %1441 = vmatprep.mubr.f32.mxu0 %v2663_v0  ;;  %1512 = vmatprep.mubr.f32.mxu1 %v2663_v0  ;;  %v1551_v0 = vld [vmem:[#allocation8] sm:$0xff] }
 0x67d   :  { %v2345_v9 = vpack.c.bf16 %v1552_v8, %v1551_v0 }
 0x67e   :  { %2288 = vmatpush1.bf16.msra.mxu0 %v2769_v14  ;;  %2320 = vmatpush1.bf16.msra.mxu1 %v2836_v63  ;;  %v1196_v14 = vld [vmem:[#allocation3 + $0xc0] sm:$0xff] }
 0x67f   :  { %2290 = vmatprep.subr.bf16.mxu0 %v2773_v15  ;;  %2322 = vmatprep.subr.bf16.mxu1 %v2840_v1  ;;  %v1197_v15 = vld [vmem:[#allocation3 + $0xc8] sm:$0xff] }
 0x682   :  { %2292 = vmatpush1.bf16.msra.mxu0 %v2777_v20  ;;  %2324 = vmatpush1.bf16.msra.mxu1 %v2843_v7 }
 0x683   :  { %2294 = vmatprep.subr.bf16.mxu0 %v2781_v21  ;;  %2326 = vmatprep.subr.bf16.mxu1 %v2846_v10 }
 0x686   :  { %2296 = vmatpush1.bf16.msra.mxu0 %v2785_v26  ;;  %2328 = vmatpush1.bf16.msra.mxu1 %v2849_v17 }
 0x687   :  { %2298 = vmatprep.subr.bf16.mxu0 %v2789_v27  ;;  %2330 = vmatprep.subr.bf16.mxu1 %v2852_v18 }
 0x68a   :  { %2300 = vmatpush1.bf16.msra.mxu0 %v2793_v32  ;;  %2332 = vmatpush1.bf16.msra.mxu1 %v2855_v25 }
 0x68b   :  { %2302 = vmatprep.subr.bf16.mxu0 %v2797_v33  ;;  %2334 = vmatprep.subr.bf16.mxu1 %v2858_v28 }
 0x68e   :  { %2304 = vmatpush1.bf16.msra.mxu0 %v2801_v38  ;;  %2336 = vmatpush1.bf16.msra.mxu1 %v2861_v35 }
 0x68f   :  { %2306 = vmatprep.subr.bf16.mxu0 %v2805_v39  ;;  %2338 = vmatprep.subr.bf16.mxu1 %v2864_v36 }
 0x692   :  { %2308 = vmatpush1.bf16.msra.mxu0 %v2809_v44  ;;  %2340 = vmatpush1.bf16.msra.mxu1 %v2867_v43  ;;  %v1198_v44 = vld [vmem:[#allocation3 + $0xd0] sm:$0xff] }
 0x693   :  { %2310 = vmatprep.subr.bf16.mxu0 %v2813_v45  ;;  %2342 = vmatprep.subr.bf16.mxu1 %v2870_v46 }
 0x696   :  { %2312 = vmatpush1.bf16.msra.mxu0 %v2817_v50  ;;  %2344 = vmatpush1.bf16.msra.mxu1 %v2873_v49  ;;  %v1199_v50 = vld [vmem:[#allocation3 + $0xd8] sm:$0xff]  ;;  %v1553_v49 = vld [vmem:[#allocation8 + $0x10] sm:$0xff] }
 0x697   :  { %2346 = vmatprep.subr.bf16.mxu0 %v2345_v9  ;;  %v2349_v6 = vpack.c.bf16 %v1554_v42, %v1553_v49 }
 0x74c   :  { %v1266_v20 = vpop.f32.mrb[10].mxu0  ;;  %v1337_v21 = vpop.f32.mrb[14].mxu1 }
 0x74d   :  { %v1342_v26 = vadd.f32 %v1266_v20, %v1196_v14  ;;  %v1268_v27 = vpop.f32.mrb[11].mxu0  ;;  %v1339_v32 = vpop.f32.mrb[15].mxu1  ;;  %v1344_v45 = vadd.f32 %v1337_v21, %v1198_v44 }
 0x74e   :  { %v1343_v33 = vadd.f32 %v1268_v27, %v1197_v15  ;;  %v1345_v57 = vadd.f32 %v1339_v32, %v1199_v50  ;;  %v3160_v50 = vld [vmem:[%s3213_s3] ss:$0 sm:$0xff]  ;;  %s2664_s3 = smov [#allocation10]  }
 0x74f   :  { %v1758_v38 = vmul.f32 -1.442695, %v1342_v26  ;;  %v1760_v58 = vmul.f32 -1.442695, %v1344_v45  ;;  %s1713_s24 = sshll.u32 %s2664_s3, 4  ;;  %s1714_s24 = int_to_ptr.vmem [resolvable:$true] %s1713_s24 }
 0x750   :  { %v1759_v39 = vmul.f32 -1.442695, %v1343_v33  ;;  %s2582_s25 = scalar_lea.vmem %s1714_s24, 128  ;;  %p2587_p11 = scmp.lt.s32.totalorder %s1714_s24, %s1714_s24 }
 0x751   :  { %2484 = vpow2.f32 %v1758_v38  ;;  %p2583_p10 = scmp.ne.s32.totalorder %s1714_s24, %s2582_s25  ;;  %p2588_p12 = scmp.lt.s32.totalorder %s2582_s25, %s2582_s25 }
 0x752   :  { %2486 = vpow2.f32 %v1759_v39 }
 0x753   :  { %2488 = vtanh.f32 %v1345_v57  ;;  %p2589_p13 = por %p2588_p12, %p2587_p11 }
 0x754   :  { %2490 = vpow2.f32 %v1760_v58 }
 0x755   :  { %p2590_p0 = pnand %p2589_p13, %p2583_p10 }
 0x75b   :  { %v2485_v63 = vpop.eup %2484 }
 0x75c   :  { %v1355_v1 = vadd.f32 1.0, %v2485_v63  ;;  %v2487_v7 = vpop.eup %2486 }
 0x75d   :  { %v1356_v10 = vadd.f32 1.0, %v2487_v7  ;;  %v2489_v17 = vpop.eup %2488 }
 0x75e   :  { %2492 = vrcp.f32 %v1355_v1  ;;  %v2491_v18 = vpop.eup %2490 }
 0x75f   :  { %2494 = vrcp.f32 %v1356_v10  ;;  %v1357_v36 = vadd.f32 1.0, %v2491_v18 }
 0x761   :  { %2496 = vrcp.f32 %v1357_v36 }
 0x768   :  { %v2493_v25 = vpop.eup %2492 }
 0x769   :  { %v1366_v28 = vmul.f32 %v2493_v25, %v2489_v17  ;;  %v2495_v35 = vpop.eup %2494 }
 0x76a   :  { %v1365_v43 = vmul.f32 %v2495_v35, %v3108_v59 }
 0x76b   :  { %v2497_v2 = vpop.eup %2496 }
 0x76c   :  { %v3148_v46 = vadd.f32 %v1366_v28, %v1365_v43 }
 0x76e   :  { %2498 = vtanh.f32 %v3148_v46 }
 0x778   :  { %v2499_v3 = vpop.eup %2498 }
 0x779   :  { %v1369_v5 = vmul.f32 %v2499_v3, %v2497_v2 }
 0x77b   :  { %1442 = vmatmul.mubr.f32.vlgmr.msra.gmra.mrb[12].mxu0 %v1369_v5  ;;  %1513 = vmatmul.mubr.f32.vlgmr.msra.gmra.mrb[16].mxu1 %v1369_v5 }
 0x77c   :  { %2348 = vmatpush3.bf16.msra.mxu0 %v2345_v9  ;;  %1821 = vmatprep.mubr.f32.mxu0 %v2901_v48  ;;  %v2369_v48 = vpack.c.bf16 %v1564_v34, %v1563_v31 }
 0x77d   :  { %2350 = vmatprep.subr.bf16.mxu0 %v2349_v6 }
 0x780   :  { %2352 = vmatpush3.bf16.msra.mxu0 %v2349_v6 }
 0x781   :  { %2354 = vmatprep.subr.bf16.mxu0 %v2353_v13 }
 0x784   :  { %2356 = vmatpush3.bf16.msra.mxu0 %v2353_v13 }
 0x785   :  { %2358 = vmatprep.subr.bf16.mxu0 %v2357_v22 }
 0x788   :  { %2360 = vmatpush3.bf16.msra.mxu0 %v2357_v22 }
 0x789   :  { %2362 = vmatprep.subr.bf16.mxu0 %v2361_v4 }
 0x78c   :  { %2364 = vmatpush3.bf16.msra.mxu0 %v2361_v4 }
 0x78d   :  { %2366 = vmatprep.subr.bf16.mxu0 %v2365_v30 }
 0x790   :  { %2368 = vmatpush3.bf16.msra.mxu0 %v2365_v30 }
 0x791   :  { %2370 = vmatprep.subr.bf16.mxu0 %v2369_v48 }
 0x794   :  { %2372 = vmatpush3.bf16.msra.mxu0 %v2369_v48 }
 0x795   :  { %2374 = vmatprep.subr.bf16.mxu0 %v2373_v40 }
 0x798   :  { %2376 = vmatpush3.bf16.msra.mxu0 %v2373_v40 }
 0x79b   :  { %1822 = vmatmul.mubr.f32.vlgmr.msra.gmra.mrb[14].mxu0 %v2943_v52  ;;  %v1375_v52 = vld [vmem:[#allocation3 + $0xf0] sm:$0xff] }
 0x79c   :  { %1824 = vmatprep.mubr.f32.mxu0 %v2985_v53 }
 0x79f   :  { %1825 = vmatmul.mubr.f32.gmra.mrb[16].mxu0 %v3027_v55  ;;  %v1376_v55 = vld [vmem:[#allocation3 + $0xf8] sm:$0xff] }
 0x7a0   :  { %1827 = vmatprep.mubr.f32.mxu0 %v3069_v60 }
 0x7a3   :  { %1828 = vmatmul.mubr.f32.gmra.mrb[18].mxu0 %v3111_v62 }
 0x7a4   :  { %1830 = vmatprep.mubr.f32.mxu0 %v1369_v5 }
 0x84e   :  { %v1443_v59 = vpop.f32.mrb[12].mxu0  ;;  %v1514_v41 = vpop.f32.mrb[16].mxu1 }
 0x84f   :  { %v1519_v61 = vadd.f32 %v1443_v59, %v1373_v54  ;;  %v1445_v0 = vpop.f32.mrb[13].mxu0  ;;  %v1516_v8 = vpop.f32.mrb[17].mxu1  ;;  %v1521_v53 = vadd.f32 %v1514_v41, %v1375_v52 }
 0x850   :  { %v1520_v9 = vadd.f32 %v1445_v0, %v1374_v56  ;;  %v1522_v20 = vadd.f32 %v1516_v8, %v1376_v55 }
 0x851   :  { %v1761_v14 = vmul.f32 -1.442695, %v1519_v61  ;;  %v1763_v60 = vmul.f32 -1.442695, %v1521_v53 }
 0x852   :  { %v1762_v15 = vmul.f32 -1.442695, %v1520_v9 }
 0x853   :  { %2500 = vpow2.f32 %v1761_v14 }
 0x854   :  { %2502 = vpow2.f32 %v1762_v15 }
 0x855   :  { %2504 = vtanh.f32 %v1522_v20 }
 0x856   :  { %2506 = vpow2.f32 %v1763_v60 }
 0x85d   :  { %v2501_v21 = vpop.eup %2500 }
 0x85e   :  { %v1532_v62 = vadd.f32 1.0, %v2501_v21  ;;  %v2503_v26 = vpop.eup %2502 }
 0x85f   :  { %v1533_v27 = vadd.f32 1.0, %v2503_v26  ;;  %v2505_v32 = vpop.eup %2504 }
 0x860   :  { %2508 = vrcp.f32 %v1532_v62  ;;  %v2507_v33 = vpop.eup %2506 }
 0x861   :  { %2510 = vrcp.f32 %v1533_v27  ;;  %v1534_v45 = vadd.f32 1.0, %v2507_v33 }
 0x863   :  { %2512 = vrcp.f32 %v1534_v45 }
 0x86a   :  { %v2509_v38 = vpop.eup %2508 }
 0x86b   :  { %v1543_v39 = vmul.f32 %v2509_v38, %v2505_v32  ;;  %v2511_v44 = vpop.eup %2510 }
 0x86c   :  { %v1542_v57 = vmul.f32 %v2511_v44, %v3148_v46 }
 0x86d   :  { %v2513_v49 = vpop.eup %2512 }
 0x86e   :  { %v1823_v58 = vpop.f32.mrb[14].mxu0  ;;  %v1544_v63 = vadd.f32 %v1543_v39, %v1542_v57 }
 0x86f   :  { %v1654_v1 = vadd.f32 %v1823_v58, %v3160_v50  ;;  %v1648_v7 = vpop.f32.mrb[15].mxu0 }
 0x870   :  { %v1649_v10 = vadd.f32 %v3160_v50, %v1648_v7  ;;  %1550 = vst [vmem:[#allocation12] sm:$0xff] %v1544_v63  ;;  %2514 = vtanh.f32 %v1544_v63 }
 0x871   :  { %1688 = vst [vmem:[#allocation9 + $0x8] sm:$0xff] %v1654_v1 }
 0x872   :  { %1687 = vst [vmem:[#allocation9] sm:$0xff] %v1649_v10  ;;  %v1826_v17 = vpop.f32.mrb[16].mxu0 }
 0x873   :  { %v1664_v18 = vadd.f32 %v1826_v17, %v3160_v50  ;;  %v1658_v25 = vpop.f32.mrb[17].mxu0 }
 0x874   :  { %v1659_v28 = vadd.f32 %v3160_v50, %v1658_v25 }
 0x875   :  { %1690 = vst [vmem:[#allocation9 + $0x18] sm:$0xff] %v1664_v18 }
 0x876   :  { %1689 = vst [vmem:[#allocation9 + $0x10] sm:$0xff] %v1659_v28  ;;  %v1829_v35 = vpop.f32.mrb[18].mxu0 }
 0x877   :  { %v1674_v36 = vadd.f32 %v1829_v35, %v3160_v50  ;;  %v1668_v43 = vpop.f32.mrb[19].mxu0 }
 0x878   :  { %v1669_v46 = vadd.f32 %v3160_v50, %v1668_v43 }
 0x879   :  { %1692 = vst [vmem:[#allocation9 + $0x28] sm:$0xff] %v1674_v36 }
 0x87a   :  { %1691 = vst [vmem:[#allocation9 + $0x20] sm:$0xff] %v1669_v46  ;;  %v2515_v42 = vpop.eup %2514 }
 0x87b   :  { %v1546_v2 = vmul.f32 %v2515_v42, %v2513_v49 }
 0x87d   :  { %1831 = vmatmul.mubr.f32.gmra.mrb[20].mxu0 %v1546_v2  ;;  %1549 = vst [vmem:[#allocation10] sm:$0xff] %v1546_v2 }
 0x87e   :  { %2593 = shalt.err (!%p2590_p0)
}
 0x87f   :  { %s2594_s29 = scalar_lea.hbm %s3217_s7, 128 }
 0x880   :  { %p2595_p1 = scmp.ne.s32.totalorder %s3217_s7, %s2594_s29  ;;  %p2598_p2 = scmp.lt.u32.totalorder %s2594_s29, %s3217_s7 }
 0x882   :  { %p2600_p3 = pnand %p2598_p2, %p2595_p1 }
 0x884   :  { %2603 = shalt.err (!%p2600_p3)
}
 0x885   :  { %1716 = dma.vmem_to_hbm [thread:$0]  %s1714_s24, 128, %s3217_s7, [#allocation11]  }
 0x886   :  { %s2665_s13 = smov [#allocation12]  }
 0x887   :  { %s1723_s14 = sshll.u32 %s2665_s13, 4  ;;  %s1724_s14 = int_to_ptr.vmem [resolvable:$true] %s1723_s14 }
 0x888   :  { %s2604_s15 = scalar_lea.vmem %s1724_s14, 128  ;;  %p2609_p5 = scmp.lt.s32.totalorder %s1724_s14, %s1724_s14 }
 0x889   :  { %p2605_p4 = scmp.ne.s32.totalorder %s1724_s14, %s2604_s15  ;;  %p2610_p6 = scmp.lt.s32.totalorder %s2604_s15, %s2604_s15 }
 0x88b   :  { %p2611_p7 = por %p2610_p6, %p2609_p5 }
 0x88d   :  { %p2612_p8 = pnand %p2611_p7, %p2605_p4 }
 0x88f   :  { %2615 = shalt.err (!%p2612_p8)
}
 0x890   :  { %s2616_s20 = scalar_lea.hbm %s3218_s8, 128 }
 0x891   :  { %p2617_p9 = scmp.ne.s32.totalorder %s3218_s8, %s2616_s20  ;;  %p2620_p10 = scmp.lt.u32.totalorder %s2616_s20, %s3218_s8 }
 0x893   :  { %p2622_p11 = pnand %p2620_p10, %p2617_p9 }
 0x895   :  { %2625 = shalt.err (!%p2622_p11)
}
 0x896   :  { %1726 = dma.vmem_to_hbm [thread:$0]  %s1724_s14, 128, %s3218_s8, [#allocation11]  }
 0x897   :  { %s2666_s22 = smov [#allocation9]  }
 0x898   :  { %s1700_s5 = sshll.u32 %s2666_s22, 4  ;;  %s1701_s5 = int_to_ptr.vmem [resolvable:$true] %s1700_s5 }
 0x899   :  { %s2626_s23 = scalar_lea.vmem %s1701_s5, 1024  ;;  %p2631_p13 = scmp.lt.s32.totalorder %s1701_s5, %s1701_s5 }
 0x89a   :  { %p2627_p12 = scmp.ne.s32.totalorder %s1701_s5, %s2626_s23  ;;  %p2632_p0 = scmp.lt.s32.totalorder %s2626_s23, %s2626_s23 }
 0x89c   :  { %p2633_p1 = por %p2632_p0, %p2631_p13 }
 0x89e   :  { %p2634_p2 = pnand %p2633_p1, %p2627_p12 }
 0x950   :  { %v1832_v3 = vpop.f32.mrb[20].mxu0 }
 0x951   :  { %v1684_v5 = vadd.f32 %v1832_v3, %v3160_v50  ;;  %v1678_v6 = vpop.f32.mrb[21].mxu0 }
 0x952   :  { %v1679_v11 = vadd.f32 %v3160_v50, %v1678_v6 }
 0x953   :  { %1694 = vst [vmem:[#allocation9 + $0x38] sm:$0xff] %v1684_v5 }
 0x954   :  { %1693 = vst [vmem:[#allocation9 + $0x30] sm:$0xff] %v1679_v11 }
 0x955   :  { %2637 = shalt.err (!%p2634_p2)
}
 0x956   :  { %s2638_s24 = scalar_lea.hbm %s3216_s6, 1024 }
 0x957   :  { %p2639_p3 = scmp.ne.s32.totalorder %s3216_s6, %s2638_s24  ;;  %p2642_p4 = scmp.lt.u32.totalorder %s2638_s24, %s3216_s6 }
 0x959   :  { %p2644_p5 = pnand %p2642_p4, %p2639_p3 }
 0x95b   :  { %2647 = shalt.err (!%p2644_p5)
}
 0x95c   :  { %1706 = dma.vmem_to_hbm [thread:$0]  %s1701_s5, 1024, %s3216_s6, [#allocation5], %s2661_s0, %s2661_s0, %s2662_s30  }
 0x95d   :  { %2652 = dma.done.wait [#allocation5], 1024  }
 0x95e   :  { %2653 = vsyncadd [#allocation5], 4294966272 }
 0x95f   :  { %2654 = dma.done.wait [#allocation11], 256  }
 0x960   :  { %2655 = vsyncadd [#allocation11], 4294967040 }
 0x961   :  { %1736 = vsyncpa [#allocation4], 1 }
 0x962   :  { %1737 = vsyncpa [#allocation7], 1 }
 0x963   :  { %1738 = vsyncpa [#allocation5], 1 }
 0x964   :  { %1739 = vsyncpa [#allocation11], 1 }

</bundles_post_ra>
